<compile_context>
chip_gen: v7x
topology: tpu7x:2x2x1
jax: 0.10.0
libtpu: 0.0.40
codegen_flags: <defaults>
</compile_context>

<pallas_src>
import functools

import jax
import jax.numpy as jnp
from jax.experimental import pallas as pl
from jax.experimental.pallas import tpu as pltpu


# ----------------------------- Pallas kernel -------------------------------


def _make_encoder_kernel(H1: int, H2: int, chunk: int, mm_dtype):
    unroll = True if chunk <= 16 else 8   # short fixed loops: give LLO full view

    def kernel(xp_ref, tm1_ref, Rh1_ref, Rc1_ref, W12_ref, b12_ref,
               Rh2_ref, Rc2_ref, rep_ref, dcs_ref,
               c1_ref, h1_ref, c2_ref, h2_ref):
        ic = pl.program_id(1)            # seq-chunk index (innermost)
        nc = pl.num_programs(1)
        bb = rep_ref.shape[0]            # batch block

        # Reset the recurrent state at the start of each batch block's sequence.
        @pl.when(ic == 0)
        def _():
            c1_ref[...] = jnp.zeros_like(c1_ref)
            h1_ref[...] = jnp.zeros_like(h1_ref)
            c2_ref[...] = jnp.zeros_like(c2_ref)
            h2_ref[...] = jnp.zeros_like(h2_ref)

        # Constant bias row broadcast hoisted out of the recurrence
        # (JAX does not CSE broadcast_in_dim inside loops).
        b12b = jnp.broadcast_to(b12_ref[...], (bb, 5 * H2))

        def step(s, carry):
            c1, h1, c2, h2 = carry
            xp_s = xp_ref[s]             # (bb, 5*H1) gate preacts, biases folded
            tm1_s = tm1_ref[s]           # (bb, Hmax) = (t - 1), pre-broadcast

            # ------- layer 1: two accumulating recurrent matmuls (no concat) --
            rec1 = (jnp.dot(h1.astype(mm_dtype), Rh1_ref[...],
                            preferred_element_type=jnp.float32)
                    + jnp.dot(c1.astype(mm_dtype), Rc1_ref[...],
                              preferred_element_type=jnp.float32))
            pre1 = xp_s + rec1           # cols: [f, i, o, c_st | u]
            sg1 = jax.nn.sigmoid(pre1[:, :4 * H1])   # one fused EUP slab
            u1 = jnp.tanh(pre1[:, 4 * H1:])
            f1, i1 = sg1[:, :H1], sg1[:, H1:2 * H1]
            o1, cst1 = sg1[:, 2 * H1:3 * H1], sg1[:, 3 * H1:4 * H1]
            c1d = c1 + cst1 * tm1_s[:, :H1]          # c - c_st + c_st*t
            c1n = f1 * c1d + i1 * u1
            h1n = o1 * jnp.tanh(c1n)

            # ------- layer 2 (layer-1 output layer folded into input proj) ---
            x2 = jnp.dot(h1n.astype(mm_dtype), W12_ref[...],
                         preferred_element_type=jnp.float32) + b12b
            rec2 = (jnp.dot(h2.astype(mm_dtype), Rh2_ref[...],
                            preferred_element_type=jnp.float32)
                    + jnp.dot(c2.astype(mm_dtype), Rc2_ref[...],
                              preferred_element_type=jnp.float32))
            pre2 = x2 + rec2
            sg2 = jax.nn.sigmoid(pre2[:, :4 * H2])
            u2 = jnp.tanh(pre2[:, 4 * H2:])
            f2, i2 = sg2[:, :H2], sg2[:, H2:2 * H2]
            o2, cst2 = sg2[:, 2 * H2:3 * H2], sg2[:, 3 * H2:4 * H2]
            c2d = c2 + cst2 * tm1_s[:, :H2]
            c2n = f2 * c2d + i2 * u2
            h2n = o2 * jnp.tanh(c2n)

            return (c1n, h1n, c2n, h2n)

        init = (c1_ref[...], h1_ref[...], c2_ref[...], h2_ref[...])
        c1f, h1f, c2f, h2f = jax.lax.fori_loop(0, chunk, step, init,
                                               unroll=unroll)
        # Carry the recurrent state to the next seq chunk via VMEM scratch.
        c1_ref[...] = c1f
        h1_ref[...] = h1f
        c2_ref[...] = c2f
        h2_ref[...] = h2f

        @pl.when(ic == nc - 1)
        def _():
            rep_ref[...] = h2f           # representation = hs2[:, -1, :]
            dcs_ref[...] = c2f           # decoder_cs     = cs2[:, -1, :]

    return kernel


# ------------------------------- wrapper ------------------------------------


def tlstm_encoder_forward(x, time_diffs, seq_lens, params1, params2,
                          hidden_dim1, encoded_dim, output_dim1, output_dim2,
                          matmul_dtype=jnp.float32):
    """Fused two-layer TLSTM encoder. Returns (representation, decoder_cs).

    matmul_dtype=jnp.bfloat16 halves weight/xp matmul cost on v6e/v7x (state
    and nonlinearities stay f32); default f32 keeps the tight reference match.
    """
    # seq_lens is accepted but unused: the original module always takes
    # hs2[:, -1, :] regardless of per-sequence lengths.
    # TODO(synk): add seq_lens-based last-valid-step selection if padded
    # variable-length batches are ever required.
    del seq_lens, output_dim1, output_dim2
    f32 = jnp.float32
    b, seq, _ = x.shape
    H1, H2 = hidden_dim1, encoded_dim
    Hmax = max(H1, H2)
    p1, p2 = params1, params2

    # ---- batch padding: sublane multiple of 8; batch blocks feed a
    #      "parallel" grid axis (v7x dual-TC). ----
    bp = max(8, -(-b // 8) * 8)
    bb = min(bp, 128)
    bp = -(-bp // bb) * bb
    nb = bp // bb
    padb = bp - b
    xpd = jnp.pad(x.astype(f32), ((0, padb), (0, 0), (0, 0)))
    tpd = jnp.pad(time_diffs.astype(f32), ((0, padb), (0, 0)))

    # ---- hoisted layer-1 input projection, seq-major, columns reordered to
    #      [f, i, o, c_st, u] with all step-invariant biases folded in ----
    g1 = (jnp.einsum("bsi,ih->sbh", xpd, p1["W_all"])
          + p1["bW"] + p1["bU"])                               # (seq, bp, 4*H1)
    xp5 = jnp.concatenate(
        [g1[..., :3 * H1],
         jnp.broadcast_to(p1["bd"], (seq, bp, H1)),            # c_st slot: bd1
         g1[..., 3 * H1:]], axis=-1)                           # (seq, bp, 5*H1)

    # (t - 1), pre-broadcast to Hmax lanes, seq-major.
    tm1 = jnp.broadcast_to((tpd - 1.0).T[..., None], (seq, bp, Hmax))

    # ---- recurrent weights, reordered [f,i,o,c_st,u]; split so each step is
    #      h @ Rh + c @ Rc (no per-step [c|h] concat). ----
    def split_rec(p, H):
        U = p["U_all"]                                         # (H, 4H) f,i,o,u
        Rh = jnp.concatenate([U[:, :3 * H], jnp.zeros((H, H), f32),
                              U[:, 3 * H:]], axis=1)           # (H, 5H)
        Rc = jnp.concatenate([jnp.zeros((H, 3 * H), f32), p["Wd"],
                              jnp.zeros((H, H), f32)], axis=1)  # (H, 5H)
        return Rh, Rc

    Rh1, Rc1 = split_rec(p1, H1)
    Rh2, Rc2 = split_rec(p2, H2)

    # Fold layer-1 output layer into layer-2 input projection (same layout).
    W12g = p1["Wout"] @ p2["W_all"]                            # (H1, 4*H2)
    b12g = p1["bout"] @ p2["W_all"] + p2["bW"] + p2["bU"]      # (1, 4*H2)
    W12 = jnp.concatenate([W12g[:, :3 * H2], jnp.zeros((H1, H2), f32),
                           W12g[:, 3 * H2:]], axis=1)          # (H1, 5*H2)
    b12 = jnp.concatenate([b12g[:, :3 * H2], p2["bd"],
                           b12g[:, 3 * H2:]], axis=1)          # (1, 5*H2)

    Rh1, Rc1, Rh2, Rc2, W12 = (w.astype(matmul_dtype)
                               for w in (Rh1, Rc1, Rh2, Rc2, W12))

    # ---- seq chunking: largest divisor of seq whose double-buffered input
    #      chunks fit a modest VMEM budget (v7x-safe). ----
    per_step_bytes = bb * (5 * H1 + Hmax) * 4
    chunk = 1
    for d in range(1, seq + 1):
        if seq % d == 0 and d <= 64 and 2 * d * per_step_bytes <= (8 << 20):
            chunk = d
    n_chunks = seq // chunk

    weight_bytes = sum(int(w.size) for w in (Rh1, Rc1, Rh2, Rc2, W12, b12)) * 4
    est = (2 * 2 * chunk * per_step_bytes + weight_bytes
           + 4 * bb * (H1 + H2) * 4 + (2 << 20))
    vmem_limit = int(min(48 << 20, max(16 << 20, est)))

    def const_spec(shape):
        nd = len(shape)
        return pl.BlockSpec(shape, lambda ib, ic, _n=nd: (0,) * _n)

    kernel = _make_encoder_kernel(H1, H2, chunk, matmul_dtype)

    rep, dcs = pl.pallas_call(
        kernel,
        out_shape=(jax.ShapeDtypeStruct((bp, H2), f32),
                   jax.ShapeDtypeStruct((bp, H2), f32)),
        grid=(nb, n_chunks),
        in_specs=[
            pl.BlockSpec((chunk, bb, 5 * H1), lambda ib, ic: (ic, ib, 0)),
            pl.BlockSpec((chunk, bb, Hmax), lambda ib, ic: (ic, ib, 0)),
            const_spec(Rh1.shape), const_spec(Rc1.shape),
            const_spec(W12.shape), const_spec(b12.shape),
            const_spec(Rh2.shape), const_spec(Rc2.shape),
        ],
        out_specs=[
            pl.BlockSpec((bb, H2), lambda ib, ic: (ib, 0)),
            pl.BlockSpec((bb, H2), lambda ib, ic: (ib, 0)),
        ],
        scratch_shapes=[
            pltpu.VMEM((bb, H1), f32), pltpu.VMEM((bb, H1), f32),   # c1, h1
            pltpu.VMEM((bb, H2), f32), pltpu.VMEM((bb, H2), f32),   # c2, h2
        ],
        compiler_params=pltpu.CompilerParams(
            dimension_semantics=("parallel", "arbitrary"),
            vmem_limit_bytes=vmem_limit),
    )(xp5, tm1, Rh1, Rc1, W12, b12, Rh2, Rc2)

    return rep[:b], dcs[:b]


# -------------------------- parameter construction -------------------------


def init_linear(key, in_dim, out_dim):
    kw, kb = jax.random.split(key)
    W = jax.random.normal(kw, (in_dim, out_dim), jnp.float32) * 0.1
    b = jax.random.normal(kb, (1, out_dim), jnp.float32) * 0.1
    return W, b


def init_tlstm_params(key, input_dim, hidden_dim, output_dim):
    k1, k2, k3, k4 = jax.random.split(key, 4)
    W_all, bW = init_linear(k1, input_dim, hidden_dim * 4)
    U_all, bU = init_linear(k2, hidden_dim, hidden_dim * 4)
    Wd, bd = init_linear(k3, hidden_dim, hidden_dim)
    Wout, bout = init_linear(k4, hidden_dim, output_dim)
    return dict(W_all=W_all, bW=bW, U_all=U_all, bU=bU,
                Wd=Wd, bd=bd, Wout=Wout, bout=bout)


# ------------------------------ pure-JAX reference ---------------------------


def tlstm_layer_ref(x, time_diffs, p, H):
    b, seq, _ = x.shape
    h = jnp.zeros((b, H), jnp.float32)
    c = jnp.zeros((b, H), jnp.float32)
    hs, cs = [], []
    for s in range(seq):
        xs = x[:, s, :]
        t = time_diffs[:, s:s + 1]
        c_st = jax.nn.sigmoid(c @ p["Wd"] + p["bd"])
        c2 = c - c_st + c_st * t
        outs = xs @ p["W_all"] + p["bW"] + h @ p["U_all"] + p["bU"]
        f, i, o, ct = jnp.split(outs, 4, axis=1)
        f, i, o, ct = (jax.nn.sigmoid(f), jax.nn.sigmoid(i),
                       jax.nn.sigmoid(o), jnp.tanh(ct))
        c = f * c2 + i * ct
        h = o * jnp.tanh(c)
        hs.append(h)
        cs.append(c)
    hs = jnp.stack(hs, 1)
    cs = jnp.stack(cs, 1)
    outs = hs @ p["Wout"] + p["bout"]
    return outs, hs, cs


def tlstm_encoder_ref(x, time_diffs, p1, p2, H1, H2):
    o1, _, _ = tlstm_layer_ref(x, time_diffs, p1, H1)
    _, hs2, cs2 = tlstm_layer_ref(o1, time_diffs, p2, H2)
    return hs2[:, -1, :], cs2[:, -1, :]


# ---------------------------------- main ------------------------------------


if __name__ == "__main__":
    # module config
    in_channels = 4
    hidden_dim1 = 32
    encoded_dim = 16
    output_dim1 = 8
    output_dim2 = 4

    # small deterministic inputs: x is (batch, seq, in_channels)
    batch, seq = 2, 8
    key = jax.random.PRNGKey(0)
    kx, kt, kp1, kp2 = jax.random.split(key, 4)
    x = jax.random.normal(kx, (batch, seq, in_channels), jnp.float32)
    time_diffs = jax.random.uniform(kt, (batch, seq), jnp.float32,
                                    minval=0.1, maxval=2.0)
    seq_lens = jnp.full((batch,), seq, jnp.int32)

    params1 = init_tlstm_params(kp1, in_channels, hidden_dim1, output_dim1)
    params2 = init_tlstm_params(kp2, output_dim1, encoded_dim, output_dim2)

    fwd = jax.jit(functools.partial(
        tlstm_encoder_forward,
        hidden_dim1=hidden_dim1, encoded_dim=encoded_dim,
        output_dim1=output_dim1, output_dim2=output_dim2))

    representation, decoder_cs = fwd(x, time_diffs, seq_lens, params1, params2)
    jax.block_until_ready((representation, decoder_cs))

    # sanity check against a pure-JAX reference (original, un-fused math)
    rep_ref, cs_ref = tlstm_encoder_ref(x, time_diffs, params1, params2,
                                        hidden_dim1, encoded_dim)
    assert representation.shape == (batch, encoded_dim)
    assert decoder_cs.shape == (batch, encoded_dim)
    assert jnp.allclose(representation, rep_ref, atol=1e-4, rtol=1e-4)
    assert jnp.allclose(decoder_cs, cs_ref, atol=1e-4, rtol=1e-4)

    print("KERNEL_OK")
</pallas_src>

<mosaic_0001>
module attributes {stable_mosaic.version = 11 : i64} {
  func.func @kernel(%arg0: i32, %arg1: i32, %arg2: memref<8x8x160xf32, #tpu.memory_space<vmem>>, %arg3: memref<8x8x32xf32, #tpu.memory_space<vmem>>, %arg4: memref<32x160xf32, #tpu.memory_space<vmem>>, %arg5: memref<32x160xf32, #tpu.memory_space<vmem>>, %arg6: memref<32x80xf32, #tpu.memory_space<vmem>>, %arg7: memref<1x80xf32, #tpu.memory_space<vmem>>, %arg8: memref<16x80xf32, #tpu.memory_space<vmem>>, %arg9: memref<16x80xf32, #tpu.memory_space<vmem>>, %arg10: memref<8x16xf32, #tpu.memory_space<vmem>>, %arg11: memref<8x16xf32, #tpu.memory_space<vmem>>, %arg12: memref<8x32xf32, #tpu.memory_space<vmem>>, %arg13: memref<8x32xf32, #tpu.memory_space<vmem>>, %arg14: memref<8x16xf32, #tpu.memory_space<vmem>>, %arg15: memref<8x16xf32, #tpu.memory_space<vmem>>) attributes {dimension_semantics = [#tpu.dimension_semantics<parallel>, #tpu.dimension_semantics<arbitrary>], iteration_bounds = array<i64: 1, 1>, scalar_prefetch = 0 : i64, scratch_operands = 4 : i64, tpu.core_type = #tpu.core_type<tc>, window_params = [{transform_indices = @transform_0, window_bounds = array<i64: 8, 8, 160>}, {transform_indices = @transform_1, window_bounds = array<i64: 8, 8, 32>}, {pipeline_mode = #tpu.pipeline_mode<synchronous>, transform_indices = @transform_2, window_bounds = array<i64: 32, 160>}, {pipeline_mode = #tpu.pipeline_mode<synchronous>, transform_indices = @transform_3, window_bounds = array<i64: 32, 160>}, {pipeline_mode = #tpu.pipeline_mode<synchronous>, transform_indices = @transform_4, window_bounds = array<i64: 32, 80>}, {pipeline_mode = #tpu.pipeline_mode<synchronous>, transform_indices = @transform_5, window_bounds = array<i64: 1, 80>}, {pipeline_mode = #tpu.pipeline_mode<synchronous>, transform_indices = @transform_6, window_bounds = array<i64: 16, 80>}, {pipeline_mode = #tpu.pipeline_mode<synchronous>, transform_indices = @transform_7, window_bounds = array<i64: 16, 80>}, {transform_indices = @transform_8, window_bounds = array<i64: 8, 16>}, {transform_indices = @transform_9, window_bounds = array<i64: 8, 16>}]} {
    %c0_i32 = arith.constant 0 : i32
    %0 = arith.cmpi eq, %arg1, %c0_i32 : i32
    %1 = arith.extui %0 : i1 to i32
    %c0_i32_0 = arith.constant 0 : i32
    %2 = arith.cmpi ne, %1, %c0_i32_0 : i32
    scf.if %2 {
      %cst_188 = arith.constant 0.000000e+00 : f32
      %497 = vector.broadcast %cst_188 : f32 to vector<8x32xf32>
      %c0_189 = arith.constant 0 : index
      %c0_190 = arith.constant 0 : index
      %498 = vector.load %arg12[%c0_189, %c0_190] : memref<8x32xf32, #tpu.memory_space<vmem>>, vector<8x32xf32>
      tpu.vector_store %arg12[%c0_189, %c0_190], %497 {strides = array<i32>} : memref<8x32xf32, #tpu.memory_space<vmem>>, vector<8x32xf32>,
      %cst_191 = arith.constant 0.000000e+00 : f32
      %499 = vector.broadcast %cst_191 : f32 to vector<8x32xf32>
      %c0_192 = arith.constant 0 : index
      %c0_193 = arith.constant 0 : index
      %500 = vector.load %arg13[%c0_192, %c0_193] : memref<8x32xf32, #tpu.memory_space<vmem>>, vector<8x32xf32>
      tpu.vector_store %arg13[%c0_192, %c0_193], %499 {strides = array<i32>} : memref<8x32xf32, #tpu.memory_space<vmem>>, vector<8x32xf32>,
      %cst_194 = arith.constant 0.000000e+00 : f32
      %501 = vector.broadcast %cst_194 : f32 to vector<8x16xf32>
      %c0_195 = arith.constant 0 : index
      %c0_196 = arith.constant 0 : index
      %502 = vector.load %arg14[%c0_195, %c0_196] : memref<8x16xf32, #tpu.memory_space<vmem>>, vector<8x16xf32>
      tpu.vector_store %arg14[%c0_195, %c0_196], %501 {strides = array<i32>} : memref<8x16xf32, #tpu.memory_space<vmem>>, vector<8x16xf32>,
      %cst_197 = arith.constant 0.000000e+00 : f32
      %503 = vector.broadcast %cst_197 : f32 to vector<8x16xf32>
      %c0_198 = arith.constant 0 : index
      %c0_199 = arith.constant 0 : index
      %504 = vector.load %arg15[%c0_198, %c0_199] : memref<8x16xf32, #tpu.memory_space<vmem>>, vector<8x16xf32>
      tpu.vector_store %arg15[%c0_198, %c0_199], %503 {strides = array<i32>} : memref<8x16xf32, #tpu.memory_space<vmem>>, vector<8x16xf32>,
    } else {
    }
    %c0 = arith.constant 0 : index
    %c0_1 = arith.constant 0 : index
    %3 = vector.load %arg7[%c0, %c0_1] : memref<1x80xf32, #tpu.memory_space<vmem>>, vector<1x80xf32>
    %4 = vector.shape_cast %3 : vector<1x80xf32> to vector<1x80xf32>
    %5 = vector.broadcast %4 : vector<1x80xf32> to vector<8x80xf32>
    %c0_2 = arith.constant 0 : index
    %c0_3 = arith.constant 0 : index
    %6 = vector.load %arg12[%c0_2, %c0_3] : memref<8x32xf32, #tpu.memory_space<vmem>>, vector<8x32xf32>
    %c0_4 = arith.constant 0 : index
    %c0_5 = arith.constant 0 : index
    %7 = vector.load %arg13[%c0_4, %c0_5] : memref<8x32xf32, #tpu.memory_space<vmem>>, vector<8x32xf32>
    %c0_6 = arith.constant 0 : index
    %c0_7 = arith.constant 0 : index
    %8 = vector.load %arg14[%c0_6, %c0_7] : memref<8x16xf32, #tpu.memory_space<vmem>>, vector<8x16xf32>
    %c0_8 = arith.constant 0 : index
    %c0_9 = arith.constant 0 : index
    %9 = vector.load %arg15[%c0_8, %c0_9] : memref<8x16xf32, #tpu.memory_space<vmem>>, vector<8x16xf32>
    %c0_i32_10 = arith.constant 0 : i32
    %10 = arith.index_cast %c0_i32_10 : i32 to index
    %c0_11 = arith.constant 0 : index
    %c0_12 = arith.constant 0 : index
    %11 = vector.load %arg2[%10, %c0_11, %c0_12] : memref<8x8x160xf32, #tpu.memory_space<vmem>>, vector<1x8x160xf32>
    %12 = vector.shape_cast %11 : vector<1x8x160xf32> to vector<8x160xf32>
    %13 = arith.index_cast %c0_i32_10 : i32 to index
    %c0_13 = arith.constant 0 : index
    %c0_14 = arith.constant 0 : index
    %14 = vector.load %arg3[%13, %c0_13, %c0_14] : memref<8x8x32xf32, #tpu.memory_space<vmem>>, vector<1x8x32xf32>
    %15 = vector.shape_cast %14 : vector<1x8x32xf32> to vector<8x32xf32>
    %c0_15 = arith.constant 0 : index
    %c0_16 = arith.constant 0 : index
    %16 = vector.load %arg4[%c0_15, %c0_16] : memref<32x160xf32, #tpu.memory_space<vmem>>, vector<32x160xf32>
    %cst = arith.constant dense<0.000000e+00> : vector<8x160xf32>
    %17 = tpu.matmul %7, %16, %cst {dimension_numbers = #tpu.dot_dimension_numbers<[1], [0], [0], [1], [0, 0, 1, 1], [], []>} : vector<8x32xf32>, vector<32x160xf32>, vector<8x160xf32> -> vector<8x160xf32>
    %c0_17 = arith.constant 0 : index
    %c0_18 = arith.constant 0 : index
    %18 = vector.load %arg5[%c0_17, %c0_18] : memref<32x160xf32, #tpu.memory_space<vmem>>, vector<32x160xf32>
    %cst_19 = arith.constant dense<0.000000e+00> : vector<8x160xf32>
    %19 = tpu.matmul %6, %18, %cst_19 {dimension_numbers = #tpu.dot_dimension_numbers<[1], [0], [0], [1], [0, 0, 1, 1], [], []>} : vector<8x32xf32>, vector<32x160xf32>, vector<8x160xf32> -> vector<8x160xf32>
    %20 = arith.addf %17, %19 : vector<8x160xf32>
    %21 = arith.addf %12, %20 : vector<8x160xf32>
    %22 = vector.extract_strided_slice %21 {offsets = [0, 0], sizes = [8, 128], strides = [1, 1]} : vector<8x160xf32> to vector<8x128xf32>
    %23 = arith.negf %22 : vector<8x128xf32>
    %24 = math.exp %23 : vector<8x128xf32>
    %cst_20 = arith.constant 1.000000e+00 : f32
    %25 = vector.broadcast %cst_20 : f32 to vector<8x128xf32>
    %26 = arith.addf %25, %24 : vector<8x128xf32>
    %27 = arith.divf %25, %26 : vector<8x128xf32>
    %28 = vector.extract_strided_slice %21 {offsets = [0, 128], sizes = [8, 32], strides = [1, 1]} : vector<8x160xf32> to vector<8x32xf32>
    %29 = math.tanh %28 : vector<8x32xf32>
    %30 = vector.extract_strided_slice %27 {offsets = [0, 0], sizes = [8, 32], strides = [1, 1]} : vector<8x128xf32> to vector<8x32xf32>
    %31 = vector.extract_strided_slice %27 {offsets = [0, 32], sizes = [8, 32], strides = [1, 1]} : vector<8x128xf32> to vector<8x32xf32>
    %32 = vector.extract_strided_slice %27 {offsets = [0, 64], sizes = [8, 32], strides = [1, 1]} : vector<8x128xf32> to vector<8x32xf32>
    %33 = vector.extract_strided_slice %27 {offsets = [0, 96], sizes = [8, 32], strides = [1, 1]} : vector<8x128xf32> to vector<8x32xf32>
    %34 = arith.mulf %33, %15 : vector<8x32xf32>
    %35 = arith.addf %6, %34 : vector<8x32xf32>
    %36 = arith.mulf %30, %35 : vector<8x32xf32>
    %37 = arith.mulf %31, %29 : vector<8x32xf32>
    %38 = arith.addf %36, %37 : vector<8x32xf32>
    %39 = math.tanh %38 : vector<8x32xf32>
    %40 = arith.mulf %32, %39 : vector<8x32xf32>
    %c0_21 = arith.constant 0 : index
    %c0_22 = arith.constant 0 : index
    %41 = vector.load %arg6[%c0_21, %c0_22] : memref<32x80xf32, #tpu.memory_space<vmem>>, vector<32x80xf32>
    %cst_23 = arith.constant dense<0.000000e+00> : vector<8x80xf32>
    %42 = tpu.matmul %40, %41, %cst_23 {dimension_numbers = #tpu.dot_dimension_numbers<[1], [0], [0], [1], [0, 0, 1, 1], [], []>} : vector<8x32xf32>, vector<32x80xf32>, vector<8x80xf32> -> vector<8x80xf32>
    %43 = arith.addf %42, %5 : vector<8x80xf32>
    %c0_24 = arith.constant 0 : index
    %c0_25 = arith.constant 0 : index
    %44 = vector.load %arg8[%c0_24, %c0_25] : memref<16x80xf32, #tpu.memory_space<vmem>>, vector<16x80xf32>
    %cst_26 = arith.constant dense<0.000000e+00> : vector<8x80xf32>
    %45 = tpu.matmul %9, %44, %cst_26 {dimension_numbers = #tpu.dot_dimension_numbers<[1], [0], [0], [1], [0, 0, 1, 1], [], []>} : vector<8x16xf32>, vector<16x80xf32>, vector<8x80xf32> -> vector<8x80xf32>
    %c0_27 = arith.constant 0 : index
    %c0_28 = arith.constant 0 : index
    %46 = vector.load %arg9[%c0_27, %c0_28] : memref<16x80xf32, #tpu.memory_space<vmem>>, vector<16x80xf32>
    %cst_29 = arith.constant dense<0.000000e+00> : vector<8x80xf32>
    %47 = tpu.matmul %8, %46, %cst_29 {dimension_numbers = #tpu.dot_dimension_numbers<[1], [0], [0], [1], [0, 0, 1, 1], [], []>} : vector<8x16xf32>, vector<16x80xf32>, vector<8x80xf32> -> vector<8x80xf32>
    %48 = arith.addf %45, %47 : vector<8x80xf32>
    %49 = arith.addf %43, %48 : vector<8x80xf32>
    %50 = vector.extract_strided_slice %49 {offsets = [0, 0], sizes = [8, 64], strides = [1, 1]} : vector<8x80xf32> to vector<8x64xf32>
    %51 = arith.negf %50 : vector<8x64xf32>
    %52 = math.exp %51 : vector<8x64xf32>
    %cst_30 = arith.constant 1.000000e+00 : f32
    %53 = vector.broadcast %cst_30 : f32 to vector<8x64xf32>
    %54 = arith.addf %53, %52 : vector<8x64xf32>
    %55 = arith.divf %53, %54 : vector<8x64xf32>
    %56 = vector.extract_strided_slice %49 {offsets = [0, 64], sizes = [8, 16], strides = [1, 1]} : vector<8x80xf32> to vector<8x16xf32>
    %57 = math.tanh %56 : vector<8x16xf32>
    %58 = vector.extract_strided_slice %55 {offsets = [0, 0], sizes = [8, 16], strides = [1, 1]} : vector<8x64xf32> to vector<8x16xf32>
    %59 = vector.extract_strided_slice %55 {offsets = [0, 16], sizes = [8, 16], strides = [1, 1]} : vector<8x64xf32> to vector<8x16xf32>
    %60 = vector.extract_strided_slice %55 {offsets = [0, 32], sizes = [8, 16], strides = [1, 1]} : vector<8x64xf32> to vector<8x16xf32>
    %61 = vector.extract_strided_slice %55 {offsets = [0, 48], sizes = [8, 16], strides = [1, 1]} : vector<8x64xf32> to vector<8x16xf32>
    %62 = vector.extract_strided_slice %15 {offsets = [0, 0], sizes = [8, 16], strides = [1, 1]} : vector<8x32xf32> to vector<8x16xf32>
    %63 = arith.mulf %61, %62 : vector<8x16xf32>
    %64 = arith.addf %8, %63 : vector<8x16xf32>
    %65 = arith.mulf %58, %64 : vector<8x16xf32>
    %66 = arith.mulf %59, %57 : vector<8x16xf32>
    %67 = arith.addf %65, %66 : vector<8x16xf32>
    %68 = math.tanh %67 : vector<8x16xf32>
    %69 = arith.mulf %60, %68 : vector<8x16xf32>
    %c1_i32 = arith.constant 1 : i32
    %70 = arith.index_cast %c1_i32 : i32 to index
    %c0_31 = arith.constant 0 : index
    %c0_32 = arith.constant 0 : index
    %71 = vector.load %arg2[%70, %c0_31, %c0_32] : memref<8x8x160xf32, #tpu.memory_space<vmem>>, vector<1x8x160xf32>
    %72 = vector.shape_cast %71 : vector<1x8x160xf32> to vector<8x160xf32>
    %73 = arith.index_cast %c1_i32 : i32 to index
    %c0_33 = arith.constant 0 : index
    %c0_34 = arith.constant 0 : index
    %74 = vector.load %arg3[%73, %c0_33, %c0_34] : memref<8x8x32xf32, #tpu.memory_space<vmem>>, vector<1x8x32xf32>
    %75 = vector.shape_cast %74 : vector<1x8x32xf32> to vector<8x32xf32>
    %c0_35 = arith.constant 0 : index
    %c0_36 = arith.constant 0 : index
    %76 = vector.load %arg4[%c0_35, %c0_36] : memref<32x160xf32, #tpu.memory_space<vmem>>, vector<32x160xf32>
    %cst_37 = arith.constant dense<0.000000e+00> : vector<8x160xf32>
    %77 = tpu.matmul %40, %76, %cst_37 {dimension_numbers = #tpu.dot_dimension_numbers<[1], [0], [0], [1], [0, 0, 1, 1], [], []>} : vector<8x32xf32>, vector<32x160xf32>, vector<8x160xf32> -> vector<8x160xf32>
    %c0_38 = arith.constant 0 : index
    %c0_39 = arith.constant 0 : index
    %78 = vector.load %arg5[%c0_38, %c0_39] : memref<32x160xf32, #tpu.memory_space<vmem>>, vector<32x160xf32>
    %cst_40 = arith.constant dense<0.000000e+00> : vector<8x160xf32>
    %79 = tpu.matmul %38, %78, %cst_40 {dimension_numbers = #tpu.dot_dimension_numbers<[1], [0], [0], [1], [0, 0, 1, 1], [], []>} : vector<8x32xf32>, vector<32x160xf32>, vector<8x160xf32> -> vector<8x160xf32>
    %80 = arith.addf %77, %79 : vector<8x160xf32>
    %81 = arith.addf %72, %80 : vector<8x160xf32>
    %82 = vector.extract_strided_slice %81 {offsets = [0, 0], sizes = [8, 128], strides = [1, 1]} : vector<8x160xf32> to vector<8x128xf32>
    %83 = arith.negf %82 : vector<8x128xf32>
    %84 = math.exp %83 : vector<8x128xf32>
    %cst_41 = arith.constant 1.000000e+00 : f32
    %85 = vector.broadcast %cst_41 : f32 to vector<8x128xf32>
    %86 = arith.addf %85, %84 : vector<8x128xf32>
    %87 = arith.divf %85, %86 : vector<8x128xf32>
    %88 = vector.extract_strided_slice %81 {offsets = [0, 128], sizes = [8, 32], strides = [1, 1]} : vector<8x160xf32> to vector<8x32xf32>
    %89 = math.tanh %88 : vector<8x32xf32>
    %90 = vector.extract_strided_slice %87 {offsets = [0, 0], sizes = [8, 32], strides = [1, 1]} : vector<8x128xf32> to vector<8x32xf32>
    %91 = vector.extract_strided_slice %87 {offsets = [0, 32], sizes = [8, 32], strides = [1, 1]} : vector<8x128xf32> to vector<8x32xf32>
    %92 = vector.extract_strided_slice %87 {offsets = [0, 64], sizes = [8, 32], strides = [1, 1]} : vector<8x128xf32> to vector<8x32xf32>
    %93 = vector.extract_strided_slice %87 {offsets = [0, 96], sizes = [8, 32], strides = [1, 1]} : vector<8x128xf32> to vector<8x32xf32>
    %94 = arith.mulf %93, %75 : vector<8x32xf32>
    %95 = arith.addf %38, %94 : vector<8x32xf32>
    %96 = arith.mulf %90, %95 : vector<8x32xf32>
    %97 = arith.mulf %91, %89 : vector<8x32xf32>
    %98 = arith.addf %96, %97 : vector<8x32xf32>
    %99 = math.tanh %98 : vector<8x32xf32>
    %100 = arith.mulf %92, %99 : vector<8x32xf32>
    %c0_42 = arith.constant 0 : index
    %c0_43 = arith.constant 0 : index
    %101 = vector.load %arg6[%c0_42, %c0_43] : memref<32x80xf32, #tpu.memory_space<vmem>>, vector<32x80xf32>
    %cst_44 = arith.constant dense<0.000000e+00> : vector<8x80xf32>
    %102 = tpu.matmul %100, %101, %cst_44 {dimension_numbers = #tpu.dot_dimension_numbers<[1], [0], [0], [1], [0, 0, 1, 1], [], []>} : vector<8x32xf32>, vector<32x80xf32>, vector<8x80xf32> -> vector<8x80xf32>
    %103 = arith.addf %102, %5 : vector<8x80xf32>
    %c0_45 = arith.constant 0 : index
    %c0_46 = arith.constant 0 : index
    %104 = vector.load %arg8[%c0_45, %c0_46] : memref<16x80xf32, #tpu.memory_space<vmem>>, vector<16x80xf32>
    %cst_47 = arith.constant dense<0.000000e+00> : vector<8x80xf32>
    %105 = tpu.matmul %69, %104, %cst_47 {dimension_numbers = #tpu.dot_dimension_numbers<[1], [0], [0], [1], [0, 0, 1, 1], [], []>} : vector<8x16xf32>, vector<16x80xf32>, vector<8x80xf32> -> vector<8x80xf32>
    %c0_48 = arith.constant 0 : index
    %c0_49 = arith.constant 0 : index
    %106 = vector.load %arg9[%c0_48, %c0_49] : memref<16x80xf32, #tpu.memory_space<vmem>>, vector<16x80xf32>
    %cst_50 = arith.constant dense<0.000000e+00> : vector<8x80xf32>
    %107 = tpu.matmul %67, %106, %cst_50 {dimension_numbers = #tpu.dot_dimension_numbers<[1], [0], [0], [1], [0, 0, 1, 1], [], []>} : vector<8x16xf32>, vector<16x80xf32>, vector<8x80xf32> -> vector<8x80xf32>
    %108 = arith.addf %105, %107 : vector<8x80xf32>
    %109 = arith.addf %103, %108 : vector<8x80xf32>
    %110 = vector.extract_strided_slice %109 {offsets = [0, 0], sizes = [8, 64], strides = [1, 1]} : vector<8x80xf32> to vector<8x64xf32>
    %111 = arith.negf %110 : vector<8x64xf32>
    %112 = math.exp %111 : vector<8x64xf32>
    %cst_51 = arith.constant 1.000000e+00 : f32
    %113 = vector.broadcast %cst_51 : f32 to vector<8x64xf32>
    %114 = arith.addf %113, %112 : vector<8x64xf32>
    %115 = arith.divf %113, %114 : vector<8x64xf32>
    %116 = vector.extract_strided_slice %109 {offsets = [0, 64], sizes = [8, 16], strides = [1, 1]} : vector<8x80xf32> to vector<8x16xf32>
    %117 = math.tanh %116 : vector<8x16xf32>
    %118 = vector.extract_strided_slice %115 {offsets = [0, 0], sizes = [8, 16], strides = [1, 1]} : vector<8x64xf32> to vector<8x16xf32>
    %119 = vector.extract_strided_slice %115 {offsets = [0, 16], sizes = [8, 16], strides = [1, 1]} : vector<8x64xf32> to vector<8x16xf32>
    %120 = vector.extract_strided_slice %115 {offsets = [0, 32], sizes = [8, 16], strides = [1, 1]} : vector<8x64xf32> to vector<8x16xf32>
    %121 = vector.extract_strided_slice %115 {offsets = [0, 48], sizes = [8, 16], strides = [1, 1]} : vector<8x64xf32> to vector<8x16xf32>
    %122 = vector.extract_strided_slice %75 {offsets = [0, 0], sizes = [8, 16], strides = [1, 1]} : vector<8x32xf32> to vector<8x16xf32>
    %123 = arith.mulf %121, %122 : vector<8x16xf32>
    %124 = arith.addf %67, %123 : vector<8x16xf32>
    %125 = arith.mulf %118, %124 : vector<8x16xf32>
    %126 = arith.mulf %119, %117 : vector<8x16xf32>
    %127 = arith.addf %125, %126 : vector<8x16xf32>
    %128 = math.tanh %127 : vector<8x16xf32>
    %129 = arith.mulf %120, %128 : vector<8x16xf32>
    %c2_i32 = arith.constant 2 : i32
    %130 = arith.index_cast %c2_i32 : i32 to index
    %c0_52 = arith.constant 0 : index
    %c0_53 = arith.constant 0 : index
    %131 = vector.load %arg2[%130, %c0_52, %c0_53] : memref<8x8x160xf32, #tpu.memory_space<vmem>>, vector<1x8x160xf32>
    %132 = vector.shape_cast %131 : vector<1x8x160xf32> to vector<8x160xf32>
    %133 = arith.index_cast %c2_i32 : i32 to index
    %c0_54 = arith.constant 0 : index
    %c0_55 = arith.constant 0 : index
    %134 = vector.load %arg3[%133, %c0_54, %c0_55] : memref<8x8x32xf32, #tpu.memory_space<vmem>>, vector<1x8x32xf32>
    %135 = vector.shape_cast %134 : vector<1x8x32xf32> to vector<8x32xf32>
    %c0_56 = arith.constant 0 : index
    %c0_57 = arith.constant 0 : index
    %136 = vector.load %arg4[%c0_56, %c0_57] : memref<32x160xf32, #tpu.memory_space<vmem>>, vector<32x160xf32>
    %cst_58 = arith.constant dense<0.000000e+00> : vector<8x160xf32>
    %137 = tpu.matmul %100, %136, %cst_58 {dimension_numbers = #tpu.dot_dimension_numbers<[1], [0], [0], [1], [0, 0, 1, 1], [], []>} : vector<8x32xf32>, vector<32x160xf32>, vector<8x160xf32> -> vector<8x160xf32>
    %c0_59 = arith.constant 0 : index
    %c0_60 = arith.constant 0 : index
    %138 = vector.load %arg5[%c0_59, %c0_60] : memref<32x160xf32, #tpu.memory_space<vmem>>, vector<32x160xf32>
    %cst_61 = arith.constant dense<0.000000e+00> : vector<8x160xf32>
    %139 = tpu.matmul %98, %138, %cst_61 {dimension_numbers = #tpu.dot_dimension_numbers<[1], [0], [0], [1], [0, 0, 1, 1], [], []>} : vector<8x32xf32>, vector<32x160xf32>, vector<8x160xf32> -> vector<8x160xf32>
    %140 = arith.addf %137, %139 : vector<8x160xf32>
    %141 = arith.addf %132, %140 : vector<8x160xf32>
    %142 = vector.extract_strided_slice %141 {offsets = [0, 0], sizes = [8, 128], strides = [1, 1]} : vector<8x160xf32> to vector<8x128xf32>
    %143 = arith.negf %142 : vector<8x128xf32>
    %144 = math.exp %143 : vector<8x128xf32>
    %cst_62 = arith.constant 1.000000e+00 : f32
    %145 = vector.broadcast %cst_62 : f32 to vector<8x128xf32>
    %146 = arith.addf %145, %144 : vector<8x128xf32>
    %147 = arith.divf %145, %146 : vector<8x128xf32>
    %148 = vector.extract_strided_slice %141 {offsets = [0, 128], sizes = [8, 32], strides = [1, 1]} : vector<8x160xf32> to vector<8x32xf32>
    %149 = math.tanh %148 : vector<8x32xf32>
    %150 = vector.extract_strided_slice %147 {offsets = [0, 0], sizes = [8, 32], strides = [1, 1]} : vector<8x128xf32> to vector<8x32xf32>
    %151 = vector.extract_strided_slice %147 {offsets = [0, 32], sizes = [8, 32], strides = [1, 1]} : vector<8x128xf32> to vector<8x32xf32>
    %152 = vector.extract_strided_slice %147 {offsets = [0, 64], sizes = [8, 32], strides = [1, 1]} : vector<8x128xf32> to vector<8x32xf32>
    %153 = vector.extract_strided_slice %147 {offsets = [0, 96], sizes = [8, 32], strides = [1, 1]} : vector<8x128xf32> to vector<8x32xf32>
    %154 = arith.mulf %153, %135 : vector<8x32xf32>
    %155 = arith.addf %98, %154 : vector<8x32xf32>
    %156 = arith.mulf %150, %155 : vector<8x32xf32>
    %157 = arith.mulf %151, %149 : vector<8x32xf32>
    %158 = arith.addf %156, %157 : vector<8x32xf32>
    %159 = math.tanh %158 : vector<8x32xf32>
    %160 = arith.mulf %152, %159 : vector<8x32xf32>
    %c0_63 = arith.constant 0 : index
    %c0_64 = arith.constant 0 : index
    %161 = vector.load %arg6[%c0_63, %c0_64] : memref<32x80xf32, #tpu.memory_space<vmem>>, vector<32x80xf32>
    %cst_65 = arith.constant dense<0.000000e+00> : vector<8x80xf32>
    %162 = tpu.matmul %160, %161, %cst_65 {dimension_numbers = #tpu.dot_dimension_numbers<[1], [0], [0], [1], [0, 0, 1, 1], [], []>} : vector<8x32xf32>, vector<32x80xf32>, vector<8x80xf32> -> vector<8x80xf32>
    %163 = arith.addf %162, %5 : vector<8x80xf32>
    %c0_66 = arith.constant 0 : index
    %c0_67 = arith.constant 0 : index
    %164 = vector.load %arg8[%c0_66, %c0_67] : memref<16x80xf32, #tpu.memory_space<vmem>>, vector<16x80xf32>
    %cst_68 = arith.constant dense<0.000000e+00> : vector<8x80xf32>
    %165 = tpu.matmul %129, %164, %cst_68 {dimension_numbers = #tpu.dot_dimension_numbers<[1], [0], [0], [1], [0, 0, 1, 1], [], []>} : vector<8x16xf32>, vector<16x80xf32>, vector<8x80xf32> -> vector<8x80xf32>
    %c0_69 = arith.constant 0 : index
    %c0_70 = arith.constant 0 : index
    %166 = vector.load %arg9[%c0_69, %c0_70] : memref<16x80xf32, #tpu.memory_space<vmem>>, vector<16x80xf32>
    %cst_71 = arith.constant dense<0.000000e+00> : vector<8x80xf32>
    %167 = tpu.matmul %127, %166, %cst_71 {dimension_numbers = #tpu.dot_dimension_numbers<[1], [0], [0], [1], [0, 0, 1, 1], [], []>} : vector<8x16xf32>, vector<16x80xf32>, vector<8x80xf32> -> vector<8x80xf32>
    %168 = arith.addf %165, %167 : vector<8x80xf32>
    %169 = arith.addf %163, %168 : vector<8x80xf32>
    %170 = vector.extract_strided_slice %169 {offsets = [0, 0], sizes = [8, 64], strides = [1, 1]} : vector<8x80xf32> to vector<8x64xf32>
    %171 = arith.negf %170 : vector<8x64xf32>
    %172 = math.exp %171 : vector<8x64xf32>
    %cst_72 = arith.constant 1.000000e+00 : f32
    %173 = vector.broadcast %cst_72 : f32 to vector<8x64xf32>
    %174 = arith.addf %173, %172 : vector<8x64xf32>
    %175 = arith.divf %173, %174 : vector<8x64xf32>
    %176 = vector.extract_strided_slice %169 {offsets = [0, 64], sizes = [8, 16], strides = [1, 1]} : vector<8x80xf32> to vector<8x16xf32>
    %177 = math.tanh %176 : vector<8x16xf32>
    %178 = vector.extract_strided_slice %175 {offsets = [0, 0], sizes = [8, 16], strides = [1, 1]} : vector<8x64xf32> to vector<8x16xf32>
    %179 = vector.extract_strided_slice %175 {offsets = [0, 16], sizes = [8, 16], strides = [1, 1]} : vector<8x64xf32> to vector<8x16xf32>
    %180 = vector.extract_strided_slice %175 {offsets = [0, 32], sizes = [8, 16], strides = [1, 1]} : vector<8x64xf32> to vector<8x16xf32>
    %181 = vector.extract_strided_slice %175 {offsets = [0, 48], sizes = [8, 16], strides = [1, 1]} : vector<8x64xf32> to vector<8x16xf32>
    %182 = vector.extract_strided_slice %135 {offsets = [0, 0], sizes = [8, 16], strides = [1, 1]} : vector<8x32xf32> to vector<8x16xf32>
    %183 = arith.mulf %181, %182 : vector<8x16xf32>
    %184 = arith.addf %127, %183 : vector<8x16xf32>
    %185 = arith.mulf %178, %184 : vector<8x16xf32>
    %186 = arith.mulf %179, %177 : vector<8x16xf32>
    %187 = arith.addf %185, %186 : vector<8x16xf32>
    %188 = math.tanh %187 : vector<8x16xf32>
    %189 = arith.mulf %180, %188 : vector<8x16xf32>
    %c3_i32 = arith.constant 3 : i32
    %190 = arith.index_cast %c3_i32 : i32 to index
    %c0_73 = arith.constant 0 : index
    %c0_74 = arith.constant 0 : index
    %191 = vector.load %arg2[%190, %c0_73, %c0_74] : memref<8x8x160xf32, #tpu.memory_space<vmem>>, vector<1x8x160xf32>
    %192 = vector.shape_cast %191 : vector<1x8x160xf32> to vector<8x160xf32>
    %193 = arith.index_cast %c3_i32 : i32 to index
    %c0_75 = arith.constant 0 : index
    %c0_76 = arith.constant 0 : index
    %194 = vector.load %arg3[%193, %c0_75, %c0_76] : memref<8x8x32xf32, #tpu.memory_space<vmem>>, vector<1x8x32xf32>
    %195 = vector.shape_cast %194 : vector<1x8x32xf32> to vector<8x32xf32>
    %c0_77 = arith.constant 0 : index
    %c0_78 = arith.constant 0 : index
    %196 = vector.load %arg4[%c0_77, %c0_78] : memref<32x160xf32, #tpu.memory_space<vmem>>, vector<32x160xf32>
    %cst_79 = arith.constant dense<0.000000e+00> : vector<8x160xf32>
    %197 = tpu.matmul %160, %196, %cst_79 {dimension_numbers = #tpu.dot_dimension_numbers<[1], [0], [0], [1], [0, 0, 1, 1], [], []>} : vector<8x32xf32>, vector<32x160xf32>, vector<8x160xf32> -> vector<8x160xf32>
    %c0_80 = arith.constant 0 : index
    %c0_81 = arith.constant 0 : index
    %198 = vector.load %arg5[%c0_80, %c0_81] : memref<32x160xf32, #tpu.memory_space<vmem>>, vector<32x160xf32>
    %cst_82 = arith.constant dense<0.000000e+00> : vector<8x160xf32>
    %199 = tpu.matmul %158, %198, %cst_82 {dimension_numbers = #tpu.dot_dimension_numbers<[1], [0], [0], [1], [0, 0, 1, 1], [], []>} : vector<8x32xf32>, vector<32x160xf32>, vector<8x160xf32> -> vector<8x160xf32>
    %200 = arith.addf %197, %199 : vector<8x160xf32>
    %201 = arith.addf %192, %200 : vector<8x160xf32>
    %202 = vector.extract_strided_slice %201 {offsets = [0, 0], sizes = [8, 128], strides = [1, 1]} : vector<8x160xf32> to vector<8x128xf32>
    %203 = arith.negf %202 : vector<8x128xf32>
    %204 = math.exp %203 : vector<8x128xf32>
    %cst_83 = arith.constant 1.000000e+00 : f32
    %205 = vector.broadcast %cst_83 : f32 to vector<8x128xf32>
    %206 = arith.addf %205, %204 : vector<8x128xf32>
    %207 = arith.divf %205, %206 : vector<8x128xf32>
    %208 = vector.extract_strided_slice %201 {offsets = [0, 128], sizes = [8, 32], strides = [1, 1]} : vector<8x160xf32> to vector<8x32xf32>
    %209 = math.tanh %208 : vector<8x32xf32>
    %210 = vector.extract_strided_slice %207 {offsets = [0, 0], sizes = [8, 32], strides = [1, 1]} : vector<8x128xf32> to vector<8x32xf32>
    %211 = vector.extract_strided_slice %207 {offsets = [0, 32], sizes = [8, 32], strides = [1, 1]} : vector<8x128xf32> to vector<8x32xf32>
    %212 = vector.extract_strided_slice %207 {offsets = [0, 64], sizes = [8, 32], strides = [1, 1]} : vector<8x128xf32> to vector<8x32xf32>
    %213 = vector.extract_strided_slice %207 {offsets = [0, 96], sizes = [8, 32], strides = [1, 1]} : vector<8x128xf32> to vector<8x32xf32>
    %214 = arith.mulf %213, %195 : vector<8x32xf32>
    %215 = arith.addf %158, %214 : vector<8x32xf32>
    %216 = arith.mulf %210, %215 : vector<8x32xf32>
    %217 = arith.mulf %211, %209 : vector<8x32xf32>
    %218 = arith.addf %216, %217 : vector<8x32xf32>
    %219 = math.tanh %218 : vector<8x32xf32>
    %220 = arith.mulf %212, %219 : vector<8x32xf32>
    %c0_84 = arith.constant 0 : index
    %c0_85 = arith.constant 0 : index
    %221 = vector.load %arg6[%c0_84, %c0_85] : memref<32x80xf32, #tpu.memory_space<vmem>>, vector<32x80xf32>
    %cst_86 = arith.constant dense<0.000000e+00> : vector<8x80xf32>
    %222 = tpu.matmul %220, %221, %cst_86 {dimension_numbers = #tpu.dot_dimension_numbers<[1], [0], [0], [1], [0, 0, 1, 1], [], []>} : vector<8x32xf32>, vector<32x80xf32>, vector<8x80xf32> -> vector<8x80xf32>
    %223 = arith.addf %222, %5 : vector<8x80xf32>
    %c0_87 = arith.constant 0 : index
    %c0_88 = arith.constant 0 : index
    %224 = vector.load %arg8[%c0_87, %c0_88] : memref<16x80xf32, #tpu.memory_space<vmem>>, vector<16x80xf32>
    %cst_89 = arith.constant dense<0.000000e+00> : vector<8x80xf32>
    %225 = tpu.matmul %189, %224, %cst_89 {dimension_numbers = #tpu.dot_dimension_numbers<[1], [0], [0], [1], [0, 0, 1, 1], [], []>} : vector<8x16xf32>, vector<16x80xf32>, vector<8x80xf32> -> vector<8x80xf32>
    %c0_90 = arith.constant 0 : index
    %c0_91 = arith.constant 0 : index
    %226 = vector.load %arg9[%c0_90, %c0_91] : memref<16x80xf32, #tpu.memory_space<vmem>>, vector<16x80xf32>
    %cst_92 = arith.constant dense<0.000000e+00> : vector<8x80xf32>
    %227 = tpu.matmul %187, %226, %cst_92 {dimension_numbers = #tpu.dot_dimension_numbers<[1], [0], [0], [1], [0, 0, 1, 1], [], []>} : vector<8x16xf32>, vector<16x80xf32>, vector<8x80xf32> -> vector<8x80xf32>
    %228 = arith.addf %225, %227 : vector<8x80xf32>
    %229 = arith.addf %223, %228 : vector<8x80xf32>
    %230 = vector.extract_strided_slice %229 {offsets = [0, 0], sizes = [8, 64], strides = [1, 1]} : vector<8x80xf32> to vector<8x64xf32>
    %231 = arith.negf %230 : vector<8x64xf32>
    %232 = math.exp %231 : vector<8x64xf32>
    %cst_93 = arith.constant 1.000000e+00 : f32
    %233 = vector.broadcast %cst_93 : f32 to vector<8x64xf32>
    %234 = arith.addf %233, %232 : vector<8x64xf32>
    %235 = arith.divf %233, %234 : vector<8x64xf32>
    %236 = vector.extract_strided_slice %229 {offsets = [0, 64], sizes = [8, 16], strides = [1, 1]} : vector<8x80xf32> to vector<8x16xf32>
    %237 = math.tanh %236 : vector<8x16xf32>
    %238 = vector.extract_strided_slice %235 {offsets = [0, 0], sizes = [8, 16], strides = [1, 1]} : vector<8x64xf32> to vector<8x16xf32>
    %239 = vector.extract_strided_slice %235 {offsets = [0, 16], sizes = [8, 16], strides = [1, 1]} : vector<8x64xf32> to vector<8x16xf32>
    %240 = vector.extract_strided_slice %235 {offsets = [0, 32], sizes = [8, 16], strides = [1, 1]} : vector<8x64xf32> to vector<8x16xf32>
    %241 = vector.extract_strided_slice %235 {offsets = [0, 48], sizes = [8, 16], strides = [1, 1]} : vector<8x64xf32> to vector<8x16xf32>
    %242 = vector.extract_strided_slice %195 {offsets = [0, 0], sizes = [8, 16], strides = [1, 1]} : vector<8x32xf32> to vector<8x16xf32>
    %243 = arith.mulf %241, %242 : vector<8x16xf32>
    %244 = arith.addf %187, %243 : vector<8x16xf32>
    %245 = arith.mulf %238, %244 : vector<8x16xf32>
    %246 = arith.mulf %239, %237 : vector<8x16xf32>
    %247 = arith.addf %245, %246 : vector<8x16xf32>
    %248 = math.tanh %247 : vector<8x16xf32>
    %249 = arith.mulf %240, %248 : vector<8x16xf32>
    %c4_i32 = arith.constant 4 : i32
    %250 = arith.index_cast %c4_i32 : i32 to index
    %c0_94 = arith.constant 0 : index
    %c0_95 = arith.constant 0 : index
    %251 = vector.load %arg2[%250, %c0_94, %c0_95] : memref<8x8x160xf32, #tpu.memory_space<vmem>>, vector<1x8x160xf32>
    %252 = vector.shape_cast %251 : vector<1x8x160xf32> to vector<8x160xf32>
    %253 = arith.index_cast %c4_i32 : i32 to index
    %c0_96 = arith.constant 0 : index
    %c0_97 = arith.constant 0 : index
    %254 = vector.load %arg3[%253, %c0_96, %c0_97] : memref<8x8x32xf32, #tpu.memory_space<vmem>>, vector<1x8x32xf32>
    %255 = vector.shape_cast %254 : vector<1x8x32xf32> to vector<8x32xf32>
    %c0_98 = arith.constant 0 : index
    %c0_99 = arith.constant 0 : index
    %256 = vector.load %arg4[%c0_98, %c0_99] : memref<32x160xf32, #tpu.memory_space<vmem>>, vector<32x160xf32>
    %cst_100 = arith.constant dense<0.000000e+00> : vector<8x160xf32>
    %257 = tpu.matmul %220, %256, %cst_100 {dimension_numbers = #tpu.dot_dimension_numbers<[1], [0], [0], [1], [0, 0, 1, 1], [], []>} : vector<8x32xf32>, vector<32x160xf32>, vector<8x160xf32> -> vector<8x160xf32>
    %c0_101 = arith.constant 0 : index
    %c0_102 = arith.constant 0 : index
    %258 = vector.load %arg5[%c0_101, %c0_102] : memref<32x160xf32, #tpu.memory_space<vmem>>, vector<32x160xf32>
    %cst_103 = arith.constant dense<0.000000e+00> : vector<8x160xf32>
    %259 = tpu.matmul %218, %258, %cst_103 {dimension_numbers = #tpu.dot_dimension_numbers<[1], [0], [0], [1], [0, 0, 1, 1], [], []>} : vector<8x32xf32>, vector<32x160xf32>, vector<8x160xf32> -> vector<8x160xf32>
    %260 = arith.addf %257, %259 : vector<8x160xf32>
    %261 = arith.addf %252, %260 : vector<8x160xf32>
    %262 = vector.extract_strided_slice %261 {offsets = [0, 0], sizes = [8, 128], strides = [1, 1]} : vector<8x160xf32> to vector<8x128xf32>
    %263 = arith.negf %262 : vector<8x128xf32>
    %264 = math.exp %263 : vector<8x128xf32>
    %cst_104 = arith.constant 1.000000e+00 : f32
    %265 = vector.broadcast %cst_104 : f32 to vector<8x128xf32>
    %266 = arith.addf %265, %264 : vector<8x128xf32>
    %267 = arith.divf %265, %266 : vector<8x128xf32>
    %268 = vector.extract_strided_slice %261 {offsets = [0, 128], sizes = [8, 32], strides = [1, 1]} : vector<8x160xf32> to vector<8x32xf32>
    %269 = math.tanh %268 : vector<8x32xf32>
    %270 = vector.extract_strided_slice %267 {offsets = [0, 0], sizes = [8, 32], strides = [1, 1]} : vector<8x128xf32> to vector<8x32xf32>
    %271 = vector.extract_strided_slice %267 {offsets = [0, 32], sizes = [8, 32], strides = [1, 1]} : vector<8x128xf32> to vector<8x32xf32>
    %272 = vector.extract_strided_slice %267 {offsets = [0, 64], sizes = [8, 32], strides = [1, 1]} : vector<8x128xf32> to vector<8x32xf32>
    %273 = vector.extract_strided_slice %267 {offsets = [0, 96], sizes = [8, 32], strides = [1, 1]} : vector<8x128xf32> to vector<8x32xf32>
    %274 = arith.mulf %273, %255 : vector<8x32xf32>
    %275 = arith.addf %218, %274 : vector<8x32xf32>
    %276 = arith.mulf %270, %275 : vector<8x32xf32>
    %277 = arith.mulf %271, %269 : vector<8x32xf32>
    %278 = arith.addf %276, %277 : vector<8x32xf32>
    %279 = math.tanh %278 : vector<8x32xf32>
    %280 = arith.mulf %272, %279 : vector<8x32xf32>
    %c0_105 = arith.constant 0 : index
    %c0_106 = arith.constant 0 : index
    %281 = vector.load %arg6[%c0_105, %c0_106] : memref<32x80xf32, #tpu.memory_space<vmem>>, vector<32x80xf32>
    %cst_107 = arith.constant dense<0.000000e+00> : vector<8x80xf32>
    %282 = tpu.matmul %280, %281, %cst_107 {dimension_numbers = #tpu.dot_dimension_numbers<[1], [0], [0], [1], [0, 0, 1, 1], [], []>} : vector<8x32xf32>, vector<32x80xf32>, vector<8x80xf32> -> vector<8x80xf32>
    %283 = arith.addf %282, %5 : vector<8x80xf32>
    %c0_108 = arith.constant 0 : index
    %c0_109 = arith.constant 0 : index
    %284 = vector.load %arg8[%c0_108, %c0_109] : memref<16x80xf32, #tpu.memory_space<vmem>>, vector<16x80xf32>
    %cst_110 = arith.constant dense<0.000000e+00> : vector<8x80xf32>
    %285 = tpu.matmul %249, %284, %cst_110 {dimension_numbers = #tpu.dot_dimension_numbers<[1], [0], [0], [1], [0, 0, 1, 1], [], []>} : vector<8x16xf32>, vector<16x80xf32>, vector<8x80xf32> -> vector<8x80xf32>
    %c0_111 = arith.constant 0 : index
    %c0_112 = arith.constant 0 : index
    %286 = vector.load %arg9[%c0_111, %c0_112] : memref<16x80xf32, #tpu.memory_space<vmem>>, vector<16x80xf32>
    %cst_113 = arith.constant dense<0.000000e+00> : vector<8x80xf32>
    %287 = tpu.matmul %247, %286, %cst_113 {dimension_numbers = #tpu.dot_dimension_numbers<[1], [0], [0], [1], [0, 0, 1, 1], [], []>} : vector<8x16xf32>, vector<16x80xf32>, vector<8x80xf32> -> vector<8x80xf32>
    %288 = arith.addf %285, %287 : vector<8x80xf32>
    %289 = arith.addf %283, %288 : vector<8x80xf32>
    %290 = vector.extract_strided_slice %289 {offsets = [0, 0], sizes = [8, 64], strides = [1, 1]} : vector<8x80xf32> to vector<8x64xf32>
    %291 = arith.negf %290 : vector<8x64xf32>
    %292 = math.exp %291 : vector<8x64xf32>
    %cst_114 = arith.constant 1.000000e+00 : f32
    %293 = vector.broadcast %cst_114 : f32 to vector<8x64xf32>
    %294 = arith.addf %293, %292 : vector<8x64xf32>
    %295 = arith.divf %293, %294 : vector<8x64xf32>
    %296 = vector.extract_strided_slice %289 {offsets = [0, 64], sizes = [8, 16], strides = [1, 1]} : vector<8x80xf32> to vector<8x16xf32>
    %297 = math.tanh %296 : vector<8x16xf32>
    %298 = vector.extract_strided_slice %295 {offsets = [0, 0], sizes = [8, 16], strides = [1, 1]} : vector<8x64xf32> to vector<8x16xf32>
    %299 = vector.extract_strided_slice %295 {offsets = [0, 16], sizes = [8, 16], strides = [1, 1]} : vector<8x64xf32> to vector<8x16xf32>
    %300 = vector.extract_strided_slice %295 {offsets = [0, 32], sizes = [8, 16], strides = [1, 1]} : vector<8x64xf32> to vector<8x16xf32>
    %301 = vector.extract_strided_slice %295 {offsets = [0, 48], sizes = [8, 16], strides = [1, 1]} : vector<8x64xf32> to vector<8x16xf32>
    %302 = vector.extract_strided_slice %255 {offsets = [0, 0], sizes = [8, 16], strides = [1, 1]} : vector<8x32xf32> to vector<8x16xf32>
    %303 = arith.mulf %301, %302 : vector<8x16xf32>
    %304 = arith.addf %247, %303 : vector<8x16xf32>
    %305 = arith.mulf %298, %304 : vector<8x16xf32>
    %306 = arith.mulf %299, %297 : vector<8x16xf32>
    %307 = arith.addf %305, %306 : vector<8x16xf32>
    %308 = math.tanh %307 : vector<8x16xf32>
    %309 = arith.mulf %300, %308 : vector<8x16xf32>
    %c5_i32 = arith.constant 5 : i32
    %310 = arith.index_cast %c5_i32 : i32 to index
    %c0_115 = arith.constant 0 : index
    %c0_116 = arith.constant 0 : index
    %311 = vector.load %arg2[%310, %c0_115, %c0_116] : memref<8x8x160xf32, #tpu.memory_space<vmem>>, vector<1x8x160xf32>
    %312 = vector.shape_cast %311 : vector<1x8x160xf32> to vector<8x160xf32>
    %313 = arith.index_cast %c5_i32 : i32 to index
    %c0_117 = arith.constant 0 : index
    %c0_118 = arith.constant 0 : index
    %314 = vector.load %arg3[%313, %c0_117, %c0_118] : memref<8x8x32xf32, #tpu.memory_space<vmem>>, vector<1x8x32xf32>
    %315 = vector.shape_cast %314 : vector<1x8x32xf32> to vector<8x32xf32>
    %c0_119 = arith.constant 0 : index
    %c0_120 = arith.constant 0 : index
    %316 = vector.load %arg4[%c0_119, %c0_120] : memref<32x160xf32, #tpu.memory_space<vmem>>, vector<32x160xf32>
    %cst_121 = arith.constant dense<0.000000e+00> : vector<8x160xf32>
    %317 = tpu.matmul %280, %316, %cst_121 {dimension_numbers = #tpu.dot_dimension_numbers<[1], [0], [0], [1], [0, 0, 1, 1], [], []>} : vector<8x32xf32>, vector<32x160xf32>, vector<8x160xf32> -> vector<8x160xf32>
    %c0_122 = arith.constant 0 : index
    %c0_123 = arith.constant 0 : index
    %318 = vector.load %arg5[%c0_122, %c0_123] : memref<32x160xf32, #tpu.memory_space<vmem>>, vector<32x160xf32>
    %cst_124 = arith.constant dense<0.000000e+00> : vector<8x160xf32>
    %319 = tpu.matmul %278, %318, %cst_124 {dimension_numbers = #tpu.dot_dimension_numbers<[1], [0], [0], [1], [0, 0, 1, 1], [], []>} : vector<8x32xf32>, vector<32x160xf32>, vector<8x160xf32> -> vector<8x160xf32>
    %320 = arith.addf %317, %319 : vector<8x160xf32>
    %321 = arith.addf %312, %320 : vector<8x160xf32>
    %322 = vector.extract_strided_slice %321 {offsets = [0, 0], sizes = [8, 128], strides = [1, 1]} : vector<8x160xf32> to vector<8x128xf32>
    %323 = arith.negf %322 : vector<8x128xf32>
    %324 = math.exp %323 : vector<8x128xf32>
    %cst_125 = arith.constant 1.000000e+00 : f32
    %325 = vector.broadcast %cst_125 : f32 to vector<8x128xf32>
    %326 = arith.addf %325, %324 : vector<8x128xf32>
    %327 = arith.divf %325, %326 : vector<8x128xf32>
    %328 = vector.extract_strided_slice %321 {offsets = [0, 128], sizes = [8, 32], strides = [1, 1]} : vector<8x160xf32> to vector<8x32xf32>
    %329 = math.tanh %328 : vector<8x32xf32>
    %330 = vector.extract_strided_slice %327 {offsets = [0, 0], sizes = [8, 32], strides = [1, 1]} : vector<8x128xf32> to vector<8x32xf32>
    %331 = vector.extract_strided_slice %327 {offsets = [0, 32], sizes = [8, 32], strides = [1, 1]} : vector<8x128xf32> to vector<8x32xf32>
    %332 = vector.extract_strided_slice %327 {offsets = [0, 64], sizes = [8, 32], strides = [1, 1]} : vector<8x128xf32> to vector<8x32xf32>
    %333 = vector.extract_strided_slice %327 {offsets = [0, 96], sizes = [8, 32], strides = [1, 1]} : vector<8x128xf32> to vector<8x32xf32>
    %334 = arith.mulf %333, %315 : vector<8x32xf32>
    %335 = arith.addf %278, %334 : vector<8x32xf32>
    %336 = arith.mulf %330, %335 : vector<8x32xf32>
    %337 = arith.mulf %331, %329 : vector<8x32xf32>
    %338 = arith.addf %336, %337 : vector<8x32xf32>
    %339 = math.tanh %338 : vector<8x32xf32>
    %340 = arith.mulf %332, %339 : vector<8x32xf32>
    %c0_126 = arith.constant 0 : index
    %c0_127 = arith.constant 0 : index
    %341 = vector.load %arg6[%c0_126, %c0_127] : memref<32x80xf32, #tpu.memory_space<vmem>>, vector<32x80xf32>
    %cst_128 = arith.constant dense<0.000000e+00> : vector<8x80xf32>
    %342 = tpu.matmul %340, %341, %cst_128 {dimension_numbers = #tpu.dot_dimension_numbers<[1], [0], [0], [1], [0, 0, 1, 1], [], []>} : vector<8x32xf32>, vector<32x80xf32>, vector<8x80xf32> -> vector<8x80xf32>
    %343 = arith.addf %342, %5 : vector<8x80xf32>
    %c0_129 = arith.constant 0 : index
    %c0_130 = arith.constant 0 : index
    %344 = vector.load %arg8[%c0_129, %c0_130] : memref<16x80xf32, #tpu.memory_space<vmem>>, vector<16x80xf32>
    %cst_131 = arith.constant dense<0.000000e+00> : vector<8x80xf32>
    %345 = tpu.matmul %309, %344, %cst_131 {dimension_numbers = #tpu.dot_dimension_numbers<[1], [0], [0], [1], [0, 0, 1, 1], [], []>} : vector<8x16xf32>, vector<16x80xf32>, vector<8x80xf32> -> vector<8x80xf32>
    %c0_132 = arith.constant 0 : index
    %c0_133 = arith.constant 0 : index
    %346 = vector.load %arg9[%c0_132, %c0_133] : memref<16x80xf32, #tpu.memory_space<vmem>>, vector<16x80xf32>
    %cst_134 = arith.constant dense<0.000000e+00> : vector<8x80xf32>
    %347 = tpu.matmul %307, %346, %cst_134 {dimension_numbers = #tpu.dot_dimension_numbers<[1], [0], [0], [1], [0, 0, 1, 1], [], []>} : vector<8x16xf32>, vector<16x80xf32>, vector<8x80xf32> -> vector<8x80xf32>
    %348 = arith.addf %345, %347 : vector<8x80xf32>
    %349 = arith.addf %343, %348 : vector<8x80xf32>
    %350 = vector.extract_strided_slice %349 {offsets = [0, 0], sizes = [8, 64], strides = [1, 1]} : vector<8x80xf32> to vector<8x64xf32>
    %351 = arith.negf %350 : vector<8x64xf32>
    %352 = math.exp %351 : vector<8x64xf32>
    %cst_135 = arith.constant 1.000000e+00 : f32
    %353 = vector.broadcast %cst_135 : f32 to vector<8x64xf32>
    %354 = arith.addf %353, %352 : vector<8x64xf32>
    %355 = arith.divf %353, %354 : vector<8x64xf32>
    %356 = vector.extract_strided_slice %349 {offsets = [0, 64], sizes = [8, 16], strides = [1, 1]} : vector<8x80xf32> to vector<8x16xf32>
    %357 = math.tanh %356 : vector<8x16xf32>
    %358 = vector.extract_strided_slice %355 {offsets = [0, 0], sizes = [8, 16], strides = [1, 1]} : vector<8x64xf32> to vector<8x16xf32>
    %359 = vector.extract_strided_slice %355 {offsets = [0, 16], sizes = [8, 16], strides = [1, 1]} : vector<8x64xf32> to vector<8x16xf32>
    %360 = vector.extract_strided_slice %355 {offsets = [0, 32], sizes = [8, 16], strides = [1, 1]} : vector<8x64xf32> to vector<8x16xf32>
    %361 = vector.extract_strided_slice %355 {offsets = [0, 48], sizes = [8, 16], strides = [1, 1]} : vector<8x64xf32> to vector<8x16xf32>
    %362 = vector.extract_strided_slice %315 {offsets = [0, 0], sizes = [8, 16], strides = [1, 1]} : vector<8x32xf32> to vector<8x16xf32>
    %363 = arith.mulf %361, %362 : vector<8x16xf32>
    %364 = arith.addf %307, %363 : vector<8x16xf32>
    %365 = arith.mulf %358, %364 : vector<8x16xf32>
    %366 = arith.mulf %359, %357 : vector<8x16xf32>
    %367 = arith.addf %365, %366 : vector<8x16xf32>
    %368 = math.tanh %367 : vector<8x16xf32>
    %369 = arith.mulf %360, %368 : vector<8x16xf32>
    %c6_i32 = arith.constant 6 : i32
    %370 = arith.index_cast %c6_i32 : i32 to index
    %c0_136 = arith.constant 0 : index
    %c0_137 = arith.constant 0 : index
    %371 = vector.load %arg2[%370, %c0_136, %c0_137] : memref<8x8x160xf32, #tpu.memory_space<vmem>>, vector<1x8x160xf32>
    %372 = vector.shape_cast %371 : vector<1x8x160xf32> to vector<8x160xf32>
    %373 = arith.index_cast %c6_i32 : i32 to index
    %c0_138 = arith.constant 0 : index
    %c0_139 = arith.constant 0 : index
    %374 = vector.load %arg3[%373, %c0_138, %c0_139] : memref<8x8x32xf32, #tpu.memory_space<vmem>>, vector<1x8x32xf32>
    %375 = vector.shape_cast %374 : vector<1x8x32xf32> to vector<8x32xf32>
    %c0_140 = arith.constant 0 : index
    %c0_141 = arith.constant 0 : index
    %376 = vector.load %arg4[%c0_140, %c0_141] : memref<32x160xf32, #tpu.memory_space<vmem>>, vector<32x160xf32>
    %cst_142 = arith.constant dense<0.000000e+00> : vector<8x160xf32>
    %377 = tpu.matmul %340, %376, %cst_142 {dimension_numbers = #tpu.dot_dimension_numbers<[1], [0], [0], [1], [0, 0, 1, 1], [], []>} : vector<8x32xf32>, vector<32x160xf32>, vector<8x160xf32> -> vector<8x160xf32>
    %c0_143 = arith.constant 0 : index
    %c0_144 = arith.constant 0 : index
    %378 = vector.load %arg5[%c0_143, %c0_144] : memref<32x160xf32, #tpu.memory_space<vmem>>, vector<32x160xf32>
    %cst_145 = arith.constant dense<0.000000e+00> : vector<8x160xf32>
    %379 = tpu.matmul %338, %378, %cst_145 {dimension_numbers = #tpu.dot_dimension_numbers<[1], [0], [0], [1], [0, 0, 1, 1], [], []>} : vector<8x32xf32>, vector<32x160xf32>, vector<8x160xf32> -> vector<8x160xf32>
    %380 = arith.addf %377, %379 : vector<8x160xf32>
    %381 = arith.addf %372, %380 : vector<8x160xf32>
    %382 = vector.extract_strided_slice %381 {offsets = [0, 0], sizes = [8, 128], strides = [1, 1]} : vector<8x160xf32> to vector<8x128xf32>
    %383 = arith.negf %382 : vector<8x128xf32>
    %384 = math.exp %383 : vector<8x128xf32>
    %cst_146 = arith.constant 1.000000e+00 : f32
    %385 = vector.broadcast %cst_146 : f32 to vector<8x128xf32>
    %386 = arith.addf %385, %384 : vector<8x128xf32>
    %387 = arith.divf %385, %386 : vector<8x128xf32>
    %388 = vector.extract_strided_slice %381 {offsets = [0, 128], sizes = [8, 32], strides = [1, 1]} : vector<8x160xf32> to vector<8x32xf32>
    %389 = math.tanh %388 : vector<8x32xf32>
    %390 = vector.extract_strided_slice %387 {offsets = [0, 0], sizes = [8, 32], strides = [1, 1]} : vector<8x128xf32> to vector<8x32xf32>
    %391 = vector.extract_strided_slice %387 {offsets = [0, 32], sizes = [8, 32], strides = [1, 1]} : vector<8x128xf32> to vector<8x32xf32>
    %392 = vector.extract_strided_slice %387 {offsets = [0, 64], sizes = [8, 32], strides = [1, 1]} : vector<8x128xf32> to vector<8x32xf32>
    %393 = vector.extract_strided_slice %387 {offsets = [0, 96], sizes = [8, 32], strides = [1, 1]} : vector<8x128xf32> to vector<8x32xf32>
    %394 = arith.mulf %393, %375 : vector<8x32xf32>
    %395 = arith.addf %338, %394 : vector<8x32xf32>
    %396 = arith.mulf %390, %395 : vector<8x32xf32>
    %397 = arith.mulf %391, %389 : vector<8x32xf32>
    %398 = arith.addf %396, %397 : vector<8x32xf32>
    %399 = math.tanh %398 : vector<8x32xf32>
    %400 = arith.mulf %392, %399 : vector<8x32xf32>
    %c0_147 = arith.constant 0 : index
    %c0_148 = arith.constant 0 : index
    %401 = vector.load %arg6[%c0_147, %c0_148] : memref<32x80xf32, #tpu.memory_space<vmem>>, vector<32x80xf32>
    %cst_149 = arith.constant dense<0.000000e+00> : vector<8x80xf32>
    %402 = tpu.matmul %400, %401, %cst_149 {dimension_numbers = #tpu.dot_dimension_numbers<[1], [0], [0], [1], [0, 0, 1, 1], [], []>} : vector<8x32xf32>, vector<32x80xf32>, vector<8x80xf32> -> vector<8x80xf32>
    %403 = arith.addf %402, %5 : vector<8x80xf32>
    %c0_150 = arith.constant 0 : index
    %c0_151 = arith.constant 0 : index
    %404 = vector.load %arg8[%c0_150, %c0_151] : memref<16x80xf32, #tpu.memory_space<vmem>>, vector<16x80xf32>
    %cst_152 = arith.constant dense<0.000000e+00> : vector<8x80xf32>
    %405 = tpu.matmul %369, %404, %cst_152 {dimension_numbers = #tpu.dot_dimension_numbers<[1], [0], [0], [1], [0, 0, 1, 1], [], []>} : vector<8x16xf32>, vector<16x80xf32>, vector<8x80xf32> -> vector<8x80xf32>
    %c0_153 = arith.constant 0 : index
    %c0_154 = arith.constant 0 : index
    %406 = vector.load %arg9[%c0_153, %c0_154] : memref<16x80xf32, #tpu.memory_space<vmem>>, vector<16x80xf32>
    %cst_155 = arith.constant dense<0.000000e+00> : vector<8x80xf32>
    %407 = tpu.matmul %367, %406, %cst_155 {dimension_numbers = #tpu.dot_dimension_numbers<[1], [0], [0], [1], [0, 0, 1, 1], [], []>} : vector<8x16xf32>, vector<16x80xf32>, vector<8x80xf32> -> vector<8x80xf32>
    %408 = arith.addf %405, %407 : vector<8x80xf32>
    %409 = arith.addf %403, %408 : vector<8x80xf32>
    %410 = vector.extract_strided_slice %409 {offsets = [0, 0], sizes = [8, 64], strides = [1, 1]} : vector<8x80xf32> to vector<8x64xf32>
    %411 = arith.negf %410 : vector<8x64xf32>
    %412 = math.exp %411 : vector<8x64xf32>
    %cst_156 = arith.constant 1.000000e+00 : f32
    %413 = vector.broadcast %cst_156 : f32 to vector<8x64xf32>
    %414 = arith.addf %413, %412 : vector<8x64xf32>
    %415 = arith.divf %413, %414 : vector<8x64xf32>
    %416 = vector.extract_strided_slice %409 {offsets = [0, 64], sizes = [8, 16], strides = [1, 1]} : vector<8x80xf32> to vector<8x16xf32>
    %417 = math.tanh %416 : vector<8x16xf32>
    %418 = vector.extract_strided_slice %415 {offsets = [0, 0], sizes = [8, 16], strides = [1, 1]} : vector<8x64xf32> to vector<8x16xf32>
    %419 = vector.extract_strided_slice %415 {offsets = [0, 16], sizes = [8, 16], strides = [1, 1]} : vector<8x64xf32> to vector<8x16xf32>
    %420 = vector.extract_strided_slice %415 {offsets = [0, 32], sizes = [8, 16], strides = [1, 1]} : vector<8x64xf32> to vector<8x16xf32>
    %421 = vector.extract_strided_slice %415 {offsets = [0, 48], sizes = [8, 16], strides = [1, 1]} : vector<8x64xf32> to vector<8x16xf32>
    %422 = vector.extract_strided_slice %375 {offsets = [0, 0], sizes = [8, 16], strides = [1, 1]} : vector<8x32xf32> to vector<8x16xf32>
    %423 = arith.mulf %421, %422 : vector<8x16xf32>
    %424 = arith.addf %367, %423 : vector<8x16xf32>
    %425 = arith.mulf %418, %424 : vector<8x16xf32>
    %426 = arith.mulf %419, %417 : vector<8x16xf32>
    %427 = arith.addf %425, %426 : vector<8x16xf32>
    %428 = math.tanh %427 : vector<8x16xf32>
    %429 = arith.mulf %420, %428 : vector<8x16xf32>
    %c7_i32 = arith.constant 7 : i32
    %430 = arith.index_cast %c7_i32 : i32 to index
    %c0_157 = arith.constant 0 : index
    %c0_158 = arith.constant 0 : index
    %431 = vector.load %arg2[%430, %c0_157, %c0_158] : memref<8x8x160xf32, #tpu.memory_space<vmem>>, vector<1x8x160xf32>
    %432 = vector.shape_cast %431 : vector<1x8x160xf32> to vector<8x160xf32>
    %433 = arith.index_cast %c7_i32 : i32 to index
    %c0_159 = arith.constant 0 : index
    %c0_160 = arith.constant 0 : index
    %434 = vector.load %arg3[%433, %c0_159, %c0_160] : memref<8x8x32xf32, #tpu.memory_space<vmem>>, vector<1x8x32xf32>
    %435 = vector.shape_cast %434 : vector<1x8x32xf32> to vector<8x32xf32>
    %c0_161 = arith.constant 0 : index
    %c0_162 = arith.constant 0 : index
    %436 = vector.load %arg4[%c0_161, %c0_162] : memref<32x160xf32, #tpu.memory_space<vmem>>, vector<32x160xf32>
    %cst_163 = arith.constant dense<0.000000e+00> : vector<8x160xf32>
    %437 = tpu.matmul %400, %436, %cst_163 {dimension_numbers = #tpu.dot_dimension_numbers<[1], [0], [0], [1], [0, 0, 1, 1], [], []>} : vector<8x32xf32>, vector<32x160xf32>, vector<8x160xf32> -> vector<8x160xf32>
    %c0_164 = arith.constant 0 : index
    %c0_165 = arith.constant 0 : index
    %438 = vector.load %arg5[%c0_164, %c0_165] : memref<32x160xf32, #tpu.memory_space<vmem>>, vector<32x160xf32>
    %cst_166 = arith.constant dense<0.000000e+00> : vector<8x160xf32>
    %439 = tpu.matmul %398, %438, %cst_166 {dimension_numbers = #tpu.dot_dimension_numbers<[1], [0], [0], [1], [0, 0, 1, 1], [], []>} : vector<8x32xf32>, vector<32x160xf32>, vector<8x160xf32> -> vector<8x160xf32>
    %440 = arith.addf %437, %439 : vector<8x160xf32>
    %441 = arith.addf %432, %440 : vector<8x160xf32>
    %442 = vector.extract_strided_slice %441 {offsets = [0, 0], sizes = [8, 128], strides = [1, 1]} : vector<8x160xf32> to vector<8x128xf32>
    %443 = arith.negf %442 : vector<8x128xf32>
    %444 = math.exp %443 : vector<8x128xf32>
    %cst_167 = arith.constant 1.000000e+00 : f32
    %445 = vector.broadcast %cst_167 : f32 to vector<8x128xf32>
    %446 = arith.addf %445, %444 : vector<8x128xf32>
    %447 = arith.divf %445, %446 : vector<8x128xf32>
    %448 = vector.extract_strided_slice %441 {offsets = [0, 128], sizes = [8, 32], strides = [1, 1]} : vector<8x160xf32> to vector<8x32xf32>
    %449 = math.tanh %448 : vector<8x32xf32>
    %450 = vector.extract_strided_slice %447 {offsets = [0, 0], sizes = [8, 32], strides = [1, 1]} : vector<8x128xf32> to vector<8x32xf32>
    %451 = vector.extract_strided_slice %447 {offsets = [0, 32], sizes = [8, 32], strides = [1, 1]} : vector<8x128xf32> to vector<8x32xf32>
    %452 = vector.extract_strided_slice %447 {offsets = [0, 64], sizes = [8, 32], strides = [1, 1]} : vector<8x128xf32> to vector<8x32xf32>
    %453 = vector.extract_strided_slice %447 {offsets = [0, 96], sizes = [8, 32], strides = [1, 1]} : vector<8x128xf32> to vector<8x32xf32>
    %454 = arith.mulf %453, %435 : vector<8x32xf32>
    %455 = arith.addf %398, %454 : vector<8x32xf32>
    %456 = arith.mulf %450, %455 : vector<8x32xf32>
    %457 = arith.mulf %451, %449 : vector<8x32xf32>
    %458 = arith.addf %456, %457 : vector<8x32xf32>
    %459 = math.tanh %458 : vector<8x32xf32>
    %460 = arith.mulf %452, %459 : vector<8x32xf32>
    %c0_168 = arith.constant 0 : index
    %c0_169 = arith.constant 0 : index
    %461 = vector.load %arg6[%c0_168, %c0_169] : memref<32x80xf32, #tpu.memory_space<vmem>>, vector<32x80xf32>
    %cst_170 = arith.constant dense<0.000000e+00> : vector<8x80xf32>
    %462 = tpu.matmul %460, %461, %cst_170 {dimension_numbers = #tpu.dot_dimension_numbers<[1], [0], [0], [1], [0, 0, 1, 1], [], []>} : vector<8x32xf32>, vector<32x80xf32>, vector<8x80xf32> -> vector<8x80xf32>
    %463 = arith.addf %462, %5 : vector<8x80xf32>
    %c0_171 = arith.constant 0 : index
    %c0_172 = arith.constant 0 : index
    %464 = vector.load %arg8[%c0_171, %c0_172] : memref<16x80xf32, #tpu.memory_space<vmem>>, vector<16x80xf32>
    %cst_173 = arith.constant dense<0.000000e+00> : vector<8x80xf32>
    %465 = tpu.matmul %429, %464, %cst_173 {dimension_numbers = #tpu.dot_dimension_numbers<[1], [0], [0], [1], [0, 0, 1, 1], [], []>} : vector<8x16xf32>, vector<16x80xf32>, vector<8x80xf32> -> vector<8x80xf32>
    %c0_174 = arith.constant 0 : index
    %c0_175 = arith.constant 0 : index
    %466 = vector.load %arg9[%c0_174, %c0_175] : memref<16x80xf32, #tpu.memory_space<vmem>>, vector<16x80xf32>
    %cst_176 = arith.constant dense<0.000000e+00> : vector<8x80xf32>
    %467 = tpu.matmul %427, %466, %cst_176 {dimension_numbers = #tpu.dot_dimension_numbers<[1], [0], [0], [1], [0, 0, 1, 1], [], []>} : vector<8x16xf32>, vector<16x80xf32>, vector<8x80xf32> -> vector<8x80xf32>
    %468 = arith.addf %465, %467 : vector<8x80xf32>
    %469 = arith.addf %463, %468 : vector<8x80xf32>
    %470 = vector.extract_strided_slice %469 {offsets = [0, 0], sizes = [8, 64], strides = [1, 1]} : vector<8x80xf32> to vector<8x64xf32>
    %471 = arith.negf %470 : vector<8x64xf32>
    %472 = math.exp %471 : vector<8x64xf32>
    %cst_177 = arith.constant 1.000000e+00 : f32
    %473 = vector.broadcast %cst_177 : f32 to vector<8x64xf32>
    %474 = arith.addf %473, %472 : vector<8x64xf32>
    %475 = arith.divf %473, %474 : vector<8x64xf32>
    %476 = vector.extract_strided_slice %469 {offsets = [0, 64], sizes = [8, 16], strides = [1, 1]} : vector<8x80xf32> to vector<8x16xf32>
    %477 = math.tanh %476 : vector<8x16xf32>
    %478 = vector.extract_strided_slice %475 {offsets = [0, 0], sizes = [8, 16], strides = [1, 1]} : vector<8x64xf32> to vector<8x16xf32>
    %479 = vector.extract_strided_slice %475 {offsets = [0, 16], sizes = [8, 16], strides = [1, 1]} : vector<8x64xf32> to vector<8x16xf32>
    %480 = vector.extract_strided_slice %475 {offsets = [0, 32], sizes = [8, 16], strides = [1, 1]} : vector<8x64xf32> to vector<8x16xf32>
    %481 = vector.extract_strided_slice %475 {offsets = [0, 48], sizes = [8, 16], strides = [1, 1]} : vector<8x64xf32> to vector<8x16xf32>
    %482 = vector.extract_strided_slice %435 {offsets = [0, 0], sizes = [8, 16], strides = [1, 1]} : vector<8x32xf32> to vector<8x16xf32>
    %483 = arith.mulf %481, %482 : vector<8x16xf32>
    %484 = arith.addf %427, %483 : vector<8x16xf32>
    %485 = arith.mulf %478, %484 : vector<8x16xf32>
    %486 = arith.mulf %479, %477 : vector<8x16xf32>
    %487 = arith.addf %485, %486 : vector<8x16xf32>
    %488 = math.tanh %487 : vector<8x16xf32>
    %489 = arith.mulf %480, %488 : vector<8x16xf32>
    %c8_i32 = arith.constant 8 : i32
    %c0_178 = arith.constant 0 : index
    %c0_179 = arith.constant 0 : index
    %490 = vector.load %arg12[%c0_178, %c0_179] : memref<8x32xf32, #tpu.memory_space<vmem>>, vector<8x32xf32>
    tpu.vector_store %arg12[%c0_178, %c0_179], %458 {strides = array<i32>} : memref<8x32xf32, #tpu.memory_space<vmem>>, vector<8x32xf32>,
    %c0_180 = arith.constant 0 : index
    %c0_181 = arith.constant 0 : index
    %491 = vector.load %arg13[%c0_180, %c0_181] : memref<8x32xf32, #tpu.memory_space<vmem>>, vector<8x32xf32>
    tpu.vector_store %arg13[%c0_180, %c0_181], %460 {strides = array<i32>} : memref<8x32xf32, #tpu.memory_space<vmem>>, vector<8x32xf32>,
    %c0_182 = arith.constant 0 : index
    %c0_183 = arith.constant 0 : index
    %492 = vector.load %arg14[%c0_182, %c0_183] : memref<8x16xf32, #tpu.memory_space<vmem>>, vector<8x16xf32>
    tpu.vector_store %arg14[%c0_182, %c0_183], %487 {strides = array<i32>} : memref<8x16xf32, #tpu.memory_space<vmem>>, vector<8x16xf32>,
    %c0_184 = arith.constant 0 : index
    %c0_185 = arith.constant 0 : index
    %493 = vector.load %arg15[%c0_184, %c0_185] : memref<8x16xf32, #tpu.memory_space<vmem>>, vector<8x16xf32>
    tpu.vector_store %arg15[%c0_184, %c0_185], %489 {strides = array<i32>} : memref<8x16xf32, #tpu.memory_space<vmem>>, vector<8x16xf32>,
    %c0_i32_186 = arith.constant 0 : i32
    %494 = arith.cmpi eq, %arg1, %c0_i32_186 : i32
    %495 = arith.extui %494 : i1 to i32
    %c0_i32_187 = arith.constant 0 : i32
    %496 = arith.cmpi ne, %495, %c0_i32_187 : i32
    scf.if %496 {
      %c0_188 = arith.constant 0 : index
      %c0_189 = arith.constant 0 : index
      %497 = vector.load %arg10[%c0_188, %c0_189] : memref<8x16xf32, #tpu.memory_space<vmem>>, vector<8x16xf32>
      tpu.vector_store %arg10[%c0_188, %c0_189], %489 {strides = array<i32>} : memref<8x16xf32, #tpu.memory_space<vmem>>, vector<8x16xf32>,
      %c0_190 = arith.constant 0 : index
      %c0_191 = arith.constant 0 : index
      %498 = vector.load %arg11[%c0_190, %c0_191] : memref<8x16xf32, #tpu.memory_space<vmem>>, vector<8x16xf32>
      tpu.vector_store %arg11[%c0_190, %c0_191], %487 {strides = array<i32>} : memref<8x16xf32, #tpu.memory_space<vmem>>, vector<8x16xf32>,
    } else {
    }
    return
  }
  func.func @transform_0(%arg0: i32, %arg1: i32) -> (i32, i32, i32) {
    %c0_i32 = arith.constant 0 : i32
    %c0_i32_0 = arith.constant 0 : i32
    return %arg1, %arg0, %c0_i32 : i32, i32, i32
  }
  func.func @transform_1(%arg0: i32, %arg1: i32) -> (i32, i32, i32) {
    %c0_i32 = arith.constant 0 : i32
    %c0_i32_0 = arith.constant 0 : i32
    return %arg1, %arg0, %c0_i32 : i32, i32, i32
  }
  func.func @transform_2(%arg0: i32, %arg1: i32) -> (i32, i32) {
    %c0_i32 = arith.constant 0 : i32
    %c0_i32_0 = arith.constant 0 : i32
    %c0_i32_1 = arith.constant 0 : i32
    return %c0_i32, %c0_i32_0 : i32, i32
  }
  func.func @transform_3(%arg0: i32, %arg1: i32) -> (i32, i32) {
    %c0_i32 = arith.constant 0 : i32
    %c0_i32_0 = arith.constant 0 : i32
    %c0_i32_1 = arith.constant 0 : i32
    return %c0_i32, %c0_i32_0 : i32, i32
  }
  func.func @transform_4(%arg0: i32, %arg1: i32) -> (i32, i32) {
    %c0_i32 = arith.constant 0 : i32
    %c0_i32_0 = arith.constant 0 : i32
    %c0_i32_1 = arith.constant 0 : i32
    return %c0_i32, %c0_i32_0 : i32, i32
  }
  func.func @transform_5(%arg0: i32, %arg1: i32) -> (i32, i32) {
    %c0_i32 = arith.constant 0 : i32
    %c0_i32_0 = arith.constant 0 : i32
    %c0_i32_1 = arith.constant 0 : i32
    return %c0_i32, %c0_i32_0 : i32, i32
  }
  func.func @transform_6(%arg0: i32, %arg1: i32) -> (i32, i32) {
    %c0_i32 = arith.constant 0 : i32
    %c0_i32_0 = arith.constant 0 : i32
    %c0_i32_1 = arith.constant 0 : i32
    return %c0_i32, %c0_i32_0 : i32, i32
  }
  func.func @transform_7(%arg0: i32, %arg1: i32) -> (i32, i32) {
    %c0_i32 = arith.constant 0 : i32
    %c0_i32_0 = arith.constant 0 : i32
    %c0_i32_1 = arith.constant 0 : i32
    return %c0_i32, %c0_i32_0 : i32, i32
  }
  func.func @transform_8(%arg0: i32, %arg1: i32) -> (i32, i32) {
    %c0_i32 = arith.constant 0 : i32
    %c0_i32_0 = arith.constant 0 : i32
    return %arg0, %c0_i32 : i32, i32
  }
  func.func @transform_9(%arg0: i32, %arg1: i32) -> (i32, i32) {
    %c0_i32 = arith.constant 0 : i32
    %c0_i32_0 = arith.constant 0 : i32
    return %arg0, %c0_i32 : i32, i32
  }
}

</mosaic_0001>

<bundles_post_ra>
// kernel: tlstm_encoder_forward.1
= control target key start
LH: loop header
LB: loop body
LE: loop exit
PB: predicated region body
PF: predicated region fallthrough
CT: control target
= control target key end

     0   :  { %vm35_vm0 = vcmask 261120   ;;  %v4427_v3 = vmov 0.0   ;;  %s4428_s17 = smov 96   ;;  %s4429_s25 = smov 32   ;;  %v4430_v48 = vmov 0.0|0.0   ;;  %vm4431_vm1 = vmmov 0   ;;  %s5117_s3 = inlined_call_operand.vmem [shape: f32[32,160], index: 3, kind: input, shape index: {}]   ;;  %s5118_s2 = inlined_call_operand.vmem [shape: f32[32,160], index: 2, kind: input, shape index: {}]   ;;  %s5119_s1 = inlined_call_operand.vmem [shape: f32[8,8,32], index: 1, kind: input, shape index: {}]   ;;  %s5120_s0 = inlined_call_operand.vmem [shape: f32[8,8,160], index: 0, kind: input, shape index: {}]   ;;  %s5121_s4 = inlined_call_operand.vmem [shape: f32[32,80], index: 4, kind: input, shape index: {}]   ;;  %s5122_s7 = inlined_call_operand.vmem [shape: f32[16,80], index: 7, kind: input, shape index: {}]   ;;  %s5123_s6 = inlined_call_operand.vmem [shape: f32[16,80], index: 6, kind: input, shape index: {}]   ;;  %s5124_s5 = inlined_call_operand.vmem [shape: f32[1,80], index: 5, kind: input, shape index: {}]   ;;  %s5125_s9 = inlined_call_operand.vmem [shape: f32[8,16], index: 9, kind: output, shape index: {1}]   ;;  %s5126_s8 = inlined_call_operand.vmem [shape: f32[8,16], index: 8, kind: output, shape index: {0}]  }
   0x1   :  { %v64_v0 = vld [vmem:[%s5117_s3 + $0x8] sm:$0xff]  ;;  %v66_v1 = vld [vmem:[%s5117_s3 + $0x18] sm:$0xff]  ;;  %v63_v2 = vld [vmem:[%s5117_s3] sm:$0xff]  ;;  %139 = vmatprep.mubr.f32.mxu0 %v4427_v3  ;;  %36 = vst.msk [vmem:[#allocation2] sm:$0xff] %vm35_vm0, %v4427_v3  ;;  %4025 = vmatprep.subr.bf16.mxu1 %v4430_v48  ;;  %vm38_vm2 = vcmask 130048   ;;  %s4433_s14 = smov 48  }
   0x2   :  { %37 = vst.msk [vmem:[#allocation3] sm:$0xff] %vm35_vm0, %v4427_v3  ;;  %v4500_v4 = vpack.c.bf16 %v66_v1, %v64_v0  ;;  %v65_v5 = vld [vmem:[%s5117_s3 + $0x10] sm:$0xff]  ;;  %v68_v6 = vld [vmem:[%s5117_s3 + $0x28] sm:$0xff]  ;;  %v70_v7 = vld [vmem:[%s5117_s3 + $0x38] sm:$0xff]  ;;  %3817 = vmatprep.mubr.msk.f32.mxu1 %vm4431_vm1, %v4427_v3  ;;  %s4434_s28 = smov 80   ;;  %s4435_s29 = smov 112  }
   0x3   :  { %v4511_v8 = vpack.c.bf16 %v65_v5, %v63_v2  ;;  %v4513_v9 = vpack.c.bf16 %v70_v7, %v68_v6  ;;  %v67_v10 = vld [vmem:[%s5117_s3 + $0x20] sm:$0xff]  ;;  %v69_v11 = vld [vmem:[%s5117_s3 + $0x30] sm:$0xff]  ;;  %v56_v12 = vld [vmem:[%s5118_s2 + $0x8] sm:$0xff]  ;;  %39 = vst.msk [vmem:[#allocation4] sm:$0xff] %vm38_vm2, %v4427_v3 }
   0x4   :  { %4010 = vmatprep.subr.bf16.mxu0 %v4500_v4  ;;  %v58_v13 = vld [vmem:[%s5118_s2 + $0x18] sm:$0xff]  ;;  %v4529_v14 = vpack.c.bf16 %v69_v11, %v67_v10  ;;  %v55_v16 = vld [vmem:[%s5118_s2] sm:$0xff]  ;;  %v57_v17 = vld [vmem:[%s5118_s2 + $0x10] sm:$0xff]  ;;  %40 = vst.msk [vmem:[#allocation5] sm:$0xff] %vm38_vm2, %v4427_v3 }
   0x5   :  { %4012 = vmatpush1.bf16.msra.mxu0 %v4511_v8  ;;  %v4532_v15 = vpack.c.bf16 %v58_v13, %v56_v12  ;;  %v4543_v18 = vld [vmem:[%s5119_s1] sm:$0xff]  ;;  %v60_v19 = vld [vmem:[%s5118_s2 + $0x28] sm:$0xff]  ;;  %v62_v20 = vld [vmem:[%s5118_s2 + $0x38] sm:$0xff]  ;;  %v4554_v22 = vpack.c.bf16 %v57_v17, %v55_v16 }
   0x6   :  { %4014 = vmatprep.subr.bf16.mxu0 %v4513_v9  ;;  %230 = vrot.lane.b32.xlu0 %v4543_v18, %s4428_s17  ;;  %v4557_v23 = vpack.c.bf16 %v62_v20, %v60_v19  ;;  %v59_v24 = vld [vmem:[%s5118_s2 + $0x20] sm:$0xff]  ;;  %v61_v25 = vld [vmem:[%s5118_s2 + $0x30] sm:$0xff]  ;;  %v53_v29 = vld [vmem:[%s5120_s0 + $0x8] sm:$0xff] }
   0x7   :  { %v4567_v26 = vpack.c.bf16 %v61_v25, %v59_v24  ;;  %v52_v28 = vld [vmem:[%s5120_s0] sm:$0xff]  ;;  %v257_v50 = vld [vmem:[%s5121_s4 + $0x8] sm:$0xff]  ;;  %v258_v51 = vld [vmem:[%s5121_s4 + $0x10] sm:$0xff] }
   0x8   :  { %v48_v21 = vld [vmem:[#allocation2] sm:$0xff]  ;;  %v259_v53 = vld [vmem:[%s5121_s4 + $0x18] sm:$0xff]  ;;  %v4630_v58 = vld [vmem:[%s5119_s1 + $0x8] sm:$0xff] }
   0x9   :  { %4016 = vmatpush1.bf16.msra.mxu0 %v4529_v14  ;;  %v49_v27 = vld [vmem:[#allocation3] sm:$0xff]  ;;  %v256_v49 = vld [vmem:[%s5121_s4] sm:$0xff]  ;;  %v4614_v54 = vpack.c.bf16 %v259_v53, %v258_v51  ;;  %s4432_s4 = smov 64   ;;  %v3651_v6 = vld [vmem:[%s5120_s0 + $0x10] sm:$0xff] }
   0xa   :  { %4018 = vmatprep.subr.bf16.mxu0 %v4532_v15  ;;  %v4604_v52 = vpack.c.bf16 %v257_v50, %v256_v49  ;;  %v337_v59 = vld [vmem:[%s5122_s7] sm:$0xff]  ;;  %v338_v60 = vld [vmem:[%s5122_s7 + $0x8] sm:$0xff]  ;;  %v4659_v1 = vld [vmem:[#allocation4] sm:$0xff] }
   0xb   :  { %v4642_v61 = vpack.c.bf16 %v338_v60, %v337_v59  ;;  %v335_v63 = vld [vmem:[%s5123_s6] sm:$0xff]  ;;  %v336_v0 = vld [vmem:[%s5123_s6 + $0x8] sm:$0xff]  ;;  %v51_v5 = vld [vmem:[#allocation5] sm:$0xff] }
   0xc   :  { %3644 = vmatmul.mubr.msk.f32.vlgmr.msra.gmra.mrb[0].mxu0 %vm35_vm0, %v48_v21  ;;  %4027 = vmatpush3.bf16.msra.mxu1 %v4604_v52  ;;  %v4661_v2 = vpack.c.bf16 %v336_v0, %v335_v63  ;;  %v3652_v7 = vld [vmem:[%s5120_s0 + $0x18] sm:$0xff]  ;;  %v4717_v59 = vld [vmem:[%s5119_s1 + $0x10] sm:$0xff]  ;;  %v3661_v0 = vld [vmem:[%s5120_s0 + $0x20] sm:$0xff] }
   0xd   :  { %4020 = vmatpush1.bf16.msra.mxu0 %v4554_v22  ;;  %213 = vmatprep.mubr.f32.mxu0 %v4427_v3 }
   0xe   :  { %4022 = vmatprep.subr.bf16.mxu0 %v4557_v23  ;;  %4028 = vmatprep.subr.bf16.mxu1 %v4430_v48 }
  0x10   :  { %4030 = vmatpush3.bf16.msra.mxu1 %v4614_v54 }
  0x11   :  { %4024 = vmatpush1.bf16.msra.mxu0 %v4567_v26  ;;  %4031 = vmatprep.subr.bf16.mxu1 %v4430_v48 }
  0x12   :  { %4038 = vmatprep.subr.bf16.mxu0 %v4500_v4 }
  0x14   :  { %3645 = vmatmul.mubr.msk.f32.vlgmr.msra.gmra.mrb[0].mxu0 %vm35_vm0, %v49_v27 }
  0x15   :  { %4040 = vmatpush1.bf16.msra.mxu0 %v4511_v8  ;;  %592 = vmatprep.mubr.f32.mxu0 %v4427_v3 }
  0x16   :  { %4042 = vmatprep.subr.bf16.mxu0 %v4513_v9 }
  0x19   :  { %4044 = vmatpush1.bf16.msra.mxu0 %v4529_v14 }
  0x1a   :  { %4046 = vmatprep.subr.bf16.mxu0 %v4532_v15 }
  0x78   :  { %v231_v38 = vpop.permute.xlu0 %230 }
  0xe7   :  { %v215_v30 = vpop.f32.mrb[0].mxu0 }
  0xe8   :  { %v220_v31 = vadd.f32 %v215_v30, %v52_v28  ;;  %v217_v32 = vpop.f32.mrb[1].mxu0 }
  0xe9   :  { %v221_v33 = vadd.f32 %v217_v32, %v53_v29 }
  0xea   :  { %v3646_v34 = vmul.f32 -1.442695, %v220_v31 }
  0xeb   :  { %4298 = vtanh.f32 %v221_v33 }
  0xec   :  { %4300 = vpow2.f32 %v3646_v34 }
  0xf5   :  { %v4299_v35 = vpop.eup %4298 }
  0xf6   :  { %v4301_v36 = vpop.eup %4300  ;;  %241 = vrot.lane.b32.xlu0 %v4299_v35, %s4429_s25 }
  0xf7   :  { %v225_v37 = vadd.f32 1.0, %v4301_v36 }
  0xf9   :  { %4302 = vrcp.f32 %v225_v37 }
 0x103   :  { %v4303_v39 = vpop.eup %4302 }
 0x104   :  { %v233_v40 = vmul.f32 %v4303_v39, %v231_v38 }
 0x106   :  { %235 = vrot.lane.b32.xlu1 %v233_v40, %s4429_s25 }
 0x168   :  { %v242_v41 = vpop.permute.xlu0 %241 }
 0x169   :  { %v244_v42 = vmul.f32 %v4303_v39, %v242_v41 }
 0x16b   :  { %246 = vrot.lane.b32.xlu1 %v244_v42, %s4428_s17 }
 0x178   :  { %v236_v43 = vpop.permute.xlu1 %235 }
 0x179   :  { %v238_v44 = vadd.f32 %v236_v43, %v48_v21 }
 0x17b   :  { %v239_v45 = vmul.f32 %v4303_v39, %v238_v44 }
 0x1dd   :  { %v247_v46 = vpop.permute.xlu1 %246 }
 0x1de   :  { %v4588_v47 = vadd.f32 %v247_v46, %v239_v45 }
 0x1e0   :  { %4304 = vtanh.f32 %v4588_v47  ;;  %3654 = vmatmul.mubr.msk.f32.vlgmr.msra.gmra.mrb[2].mxu0 %vm35_vm0, %v4588_v47 }
 0x1e1   :  { %4048 = vmatpush1.bf16.msra.mxu0 %v4554_v22  ;;  %663 = vmatprep.mubr.f32.mxu0 %v4427_v3 }
 0x1e2   :  { %4050 = vmatprep.subr.bf16.mxu0 %v4557_v23 }
 0x1e5   :  { %4052 = vmatpush1.bf16.msra.mxu0 %v4567_v26 }
 0x1e6   :  { %4066 = vmatprep.subr.bf16.mxu0 %v4500_v4 }
 0x1ea   :  { %v4305_v55 = vpop.eup %4304 }
 0x1eb   :  { %252 = vrot.lane.b32.xlu0 %v4305_v55, %s4432_s4 }
 0x1ef   :  { %680 = vrot.lane.b32.xlu0 %v4630_v58, %s4428_s17 }
 0x1f3   :  { %494 = vrot.lane.b32.xlu0 %v4543_v18, %s4433_s14  ;;  %v4687_v18 = vld [vmem:[%s5124_s5] ss:$0 sm:$0xff] }
 0x25d   :  { %v253_v56 = vpop.permute.xlu0 %252 }
 0x25e   :  { %v255_v57 = vmul.f32 %v4303_v39, %v253_v56 }
 0x260   :  { %261 = vrot.lane.b32.xlu1 %v255_v57, %s4432_s4 }
 0x261   :  { %v681_v28 = vpop.permute.xlu0 %680 }
 0x265   :  { %v495_v34 = vpop.permute.xlu0 %494 }
 0x2d2   :  { %v262_v62 = vpop.permute.xlu1 %261 }
 0x2d3   :  { %3818 = vmatmul.mubr.msk.f32.vlgmr.msra.gmra.mrb[0].mxu1 %vm35_vm0, %v262_v62  ;;  %3655 = vmatmul.mubr.msk.f32.vlgmr.msra.gmra.mrb[2].mxu0 %vm35_vm0, %v262_v62 }
 0x2d4   :  { %4033 = vmatpush3.bf16.msra.mxu1 %v4642_v61  ;;  %3824 = vmatprep.mubr.msk.f32.mxu1 %vm4431_vm1, %v4427_v3 }
 0x2d5   :  { %4034 = vmatprep.subr.bf16.mxu1 %v4430_v48  ;;  %4068 = vmatpush1.bf16.msra.mxu0 %v4511_v8 }
 0x2d6   :  { %4070 = vmatprep.subr.bf16.mxu0 %v4513_v9  ;;  %1035 = vmatprep.mubr.f32.mxu0 %v4427_v3 }
 0x2d9   :  { %4072 = vmatpush1.bf16.msra.mxu0 %v4529_v14 }
 0x2da   :  { %4074 = vmatprep.subr.bf16.mxu0 %v4532_v15 }
 0x2db   :  { %3825 = vmatmul.mubr.msk.f32.vlgmr.msra.gmra.mrb[0].mxu1 %vm38_vm2, %v4659_v1 }
 0x2dc   :  { %4036 = vmatpush3.bf16.msra.mxu1 %v4661_v2  ;;  %3831 = vmatprep.mubr.msk.f32.mxu1 %vm4431_vm1, %v4427_v3 }
 0x2dd   :  { %4053 = vmatprep.subr.bf16.mxu1 %v4430_v48 }
 0x2e3   :  { %3832 = vmatmul.mubr.msk.f32.vlgmr.msra.gmra.mrb[0].mxu1 %vm38_vm2, %v51_v5 }
 0x2e4   :  { %4055 = vmatpush3.bf16.msra.mxu1 %v4604_v52  ;;  %3842 = vmatprep.mubr.msk.f32.mxu1 %vm4431_vm1, %v4427_v3 }
 0x2e5   :  { %4056 = vmatprep.subr.bf16.mxu1 %v4430_v48 }
 0x2e8   :  { %4058 = vmatpush3.bf16.msra.mxu1 %v4614_v54 }
 0x2e9   :  { %4059 = vmatprep.subr.bf16.mxu1 %v4430_v48 }
 0x3a6   :  { %v665_v10 = vpop.f32.mrb[2].mxu0 }
 0x3a7   :  { %v670_v11 = vadd.f32 %v3651_v6, %v665_v10  ;;  %v667_v12 = vpop.f32.mrb[3].mxu0 }
 0x3a8   :  { %v671_v13 = vadd.f32 %v3652_v7, %v667_v12 }
 0x3a9   :  { %v3656_v16 = vmul.f32 -1.442695, %v670_v11 }
 0x3aa   :  { %4306 = vtanh.f32 %v671_v13 }
 0x3ab   :  { %4308 = vpow2.f32 %v3656_v16 }
 0x3b4   :  { %v4307_v17 = vpop.eup %4306 }
 0x3b5   :  { %v4309_v19 = vpop.eup %4308  ;;  %691 = vrot.lane.b32.xlu1 %v4307_v17, %s4429_s25 }
 0x3b6   :  { %v675_v20 = vadd.f32 1.0, %v4309_v19  ;;  %v482_v21 = vpop.f32.mrb[0].mxu1 }
 0x3b7   :  { %v4233_v24 = vadd.f32 %v4687_v18, %v482_v21  ;;  %v3833_v25 = vpop.f32.mrb[1].mxu1 }
 0x3b8   :  { %4310 = vrcp.f32 %v675_v20 }
 0x3b9   :  { %v3650_v27 = vmul.f32 -1.442695, %v4233_v24  ;;  %4312 = vtanh.f32 %v4233_v24 }
 0x3bb   :  { %4314 = vpow2.f32 %v3650_v27 }
 0x3c2   :  { %v4311_v29 = vpop.eup %4310 }
 0x3c3   :  { %v4313_v30 = vpop.eup %4312  ;;  %v683_v31 = vmul.f32 %v4311_v29, %v681_v28 }
 0x3c4   :  { %505 = vrot.lane.b32.xlu1 %v4313_v30, %s4434_s28 }
 0x3c5   :  { %v4315_v32 = vpop.eup %4314  ;;  %685 = vrot.lane.b32.xlu0 %v683_v31, %s4429_s25 }
 0x3c6   :  { %v490_v33 = vadd.f32 1.0, %v4315_v32 }
 0x3c8   :  { %4316 = vrcp.f32 %v490_v33 }
 0x3d2   :  { %v4317_v35 = vpop.eup %4316 }
 0x3d3   :  { %v497_v36 = vmul.f32 %v4317_v35, %v495_v34 }
 0x3d5   :  { %499 = vrot.lane.b32.xlu0 %v497_v36, %s4434_s28 }
 0x427   :  { %v692_v37 = vpop.permute.xlu1 %691 }
 0x428   :  { %v694_v38 = vmul.f32 %v4311_v29, %v692_v37 }
 0x42a   :  { %696 = vrot.lane.b32.xlu1 %v694_v38, %s4428_s17 }
 0x436   :  { %v506_v39 = vpop.permute.xlu1 %505 }
 0x437   :  { %v508_v40 = vmul.f32 %v4317_v35, %v506_v39  ;;  %v686_v41 = vpop.permute.xlu0 %685 }
 0x438   :  { %v688_v42 = vadd.f32 %v686_v41, %v4588_v47 }
 0x439   :  { %510 = vrot.lane.b32.xlu1 %v508_v40, %s4435_s29 }
 0x43a   :  { %v689_v43 = vmul.f32 %v4311_v29, %v688_v42 }
 0x447   :  { %v500_v46 = vpop.permute.xlu0 %499 }
 0x448   :  { %v502_v47 = vadd.f32 %v500_v46, %v4659_v1  ;;  %v3662_v1 = vld [vmem:[%s5120_s0 + $0x28] sm:$0xff] }
 0x44a   :  { %v503_v50 = vmul.f32 %v4317_v35, %v502_v47 }
 0x49c   :  { %v697_v44 = vpop.permute.xlu1 %696 }
 0x49d   :  { %v4697_v45 = vadd.f32 %v697_v44, %v689_v43 }
 0x49f   :  { %4318 = vtanh.f32 %v4697_v45  ;;  %3664 = vmatmul.mubr.msk.f32.vlgmr.msra.gmra.mrb[4].mxu0 %vm35_vm0, %v4697_v45 }
 0x4a0   :  { %4076 = vmatpush1.bf16.msra.mxu0 %v4554_v22  ;;  %1106 = vmatprep.mubr.f32.mxu0 %v4427_v3 }
 0x4a1   :  { %4078 = vmatprep.subr.bf16.mxu0 %v4557_v23 }
 0x4a4   :  { %4080 = vmatpush1.bf16.msra.mxu0 %v4567_v26 }
 0x4a5   :  { %4094 = vmatprep.subr.bf16.mxu0 %v4500_v4 }
 0x4a9   :  { %v4319_v49 = vpop.eup %4318 }
 0x4aa   :  { %702 = vrot.lane.b32.xlu0 %v4319_v49, %s4432_s4 }
 0x4ab   :  { %v511_v51 = vpop.permute.xlu1 %510 }
 0x4ac   :  { %v4709_v53 = vadd.f32 %v511_v51, %v503_v50 }
 0x4ae   :  { %4320 = vtanh.f32 %v4709_v53 }
 0x4b8   :  { %v4321_v55 = vpop.eup %4320 }
 0x4b9   :  { %516 = vrot.lane.b32.xlu1 %v4321_v55, %s4429_s25 }
 0x51c   :  { %v703_v56 = vpop.permute.xlu0 %702 }
 0x51d   :  { %v705_v57 = vmul.f32 %v4311_v29, %v703_v56 }
 0x51f   :  { %707 = vrot.lane.b32.xlu0 %v705_v57, %s4432_s4 }
 0x523   :  { %1123 = vrot.lane.b32.xlu0 %v4717_v59, %s4428_s17 }
 0x527   :  { %937 = vrot.lane.b32.xlu0 %v4630_v58, %s4433_s14 }
 0x52b   :  { %v517_v60 = vpop.permute.xlu1 %516 }
 0x52c   :  { %v519_v62 = vmul.f32 %v4317_v35, %v517_v60 }
 0x52e   :  { %855 = vrot.lane.b32.xlu1 %v519_v62, %s4428_s17  ;;  %v3671_v62 = vld [vmem:[%s5120_s0 + $0x30] sm:$0xff] }
 0x591   :  { %v708_v63 = vpop.permute.xlu0 %707 }
 0x592   :  { %3843 = vmatmul.mubr.msk.f32.vlgmr.msra.gmra.mrb[2].mxu1 %vm35_vm0, %v708_v63  ;;  %3665 = vmatmul.mubr.msk.f32.vlgmr.msra.gmra.mrb[4].mxu0 %vm35_vm0, %v708_v63  ;;  %v3672_v63 = vld [vmem:[%s5120_s0 + $0x38] sm:$0xff] }
 0x593   :  { %4061 = vmatpush3.bf16.msra.mxu1 %v4642_v61  ;;  %3849 = vmatprep.mubr.msk.f32.mxu1 %vm4431_vm1, %v4427_v3 }
 0x594   :  { %4062 = vmatprep.subr.bf16.mxu1 %v4430_v48  ;;  %4096 = vmatpush1.bf16.msra.mxu0 %v4511_v8 }
 0x595   :  { %4098 = vmatprep.subr.bf16.mxu0 %v4513_v9  ;;  %1478 = vmatprep.mubr.f32.mxu0 %v4427_v3  ;;  %v1124_v24 = vpop.permute.xlu0 %1123 }
 0x598   :  { %4100 = vmatpush1.bf16.msra.mxu0 %v4529_v14 }
 0x599   :  { %4102 = vmatprep.subr.bf16.mxu0 %v4532_v15  ;;  %v938_v31 = vpop.permute.xlu0 %937 }
 0x59a   :  { %3850 = vmatmul.mubr.msk.f32.vlgmr.msra.gmra.mrb[2].mxu1 %vm38_vm2, %v4709_v53 }
 0x59b   :  { %4064 = vmatpush3.bf16.msra.mxu1 %v4661_v2  ;;  %3856 = vmatprep.mubr.msk.f32.mxu1 %vm4431_vm1, %v4427_v3 }
 0x59c   :  { %4081 = vmatprep.subr.bf16.mxu1 %v4430_v48 }
 0x5a0   :  { %v856_v58 = vpop.permute.xlu1 %855 }
 0x5a2   :  { %3857 = vmatmul.mubr.msk.f32.vlgmr.msra.gmra.mrb[2].mxu1 %vm38_vm2, %v856_v58 }
 0x5a3   :  { %4083 = vmatpush3.bf16.msra.mxu1 %v4604_v52  ;;  %3867 = vmatprep.mubr.msk.f32.mxu1 %vm4431_vm1, %v4427_v3 }
 0x5a4   :  { %4084 = vmatprep.subr.bf16.mxu1 %v4430_v48 }
 0x5a7   :  { %4086 = vmatpush3.bf16.msra.mxu1 %v4614_v54 }
 0x5a8   :  { %4087 = vmatprep.subr.bf16.mxu1 %v4430_v48 }
 0x665   :  { %v1108_v5 = vpop.f32.mrb[4].mxu0 }
 0x666   :  { %v1113_v6 = vadd.f32 %v3661_v0, %v1108_v5  ;;  %v1110_v7 = vpop.f32.mrb[5].mxu0 }
 0x667   :  { %v1114_v10 = vadd.f32 %v3662_v1, %v1110_v7 }
 0x668   :  { %v3666_v11 = vmul.f32 -1.442695, %v1113_v6 }
 0x669   :  { %4322 = vtanh.f32 %v1114_v10 }
 0x66a   :  { %4324 = vpow2.f32 %v3666_v11 }
 0x673   :  { %v4323_v12 = vpop.eup %4322 }
 0x674   :  { %v4325_v13 = vpop.eup %4324  ;;  %1134 = vrot.lane.b32.xlu1 %v4323_v12, %s4429_s25 }
 0x675   :  { %v1118_v16 = vadd.f32 1.0, %v4325_v13  ;;  %v925_v17 = vpop.f32.mrb[2].mxu1 }
 0x676   :  { %v4234_v19 = vadd.f32 %v4687_v18, %v925_v17  ;;  %v3858_v20 = vpop.f32.mrb[3].mxu1 }
 0x677   :  { %4326 = vrcp.f32 %v1118_v16 }
 0x678   :  { %v3660_v21 = vmul.f32 -1.442695, %v4234_v19  ;;  %4328 = vtanh.f32 %v4234_v19 }
 0x67a   :  { %4330 = vpow2.f32 %v3660_v21 }
 0x681   :  { %v4327_v25 = vpop.eup %4326 }
 0x682   :  { %v4329_v27 = vpop.eup %4328  ;;  %v1126_v28 = vmul.f32 %v4327_v25, %v1124_v24 }
 0x683   :  { %948 = vrot.lane.b32.xlu1 %v4329_v27, %s4434_s28 }
 0x684   :  { %v4331_v29 = vpop.eup %4330  ;;  %1128 = vrot.lane.b32.xlu0 %v1126_v28, %s4429_s25 }
 0x685   :  { %v933_v30 = vadd.f32 1.0, %v4331_v29 }
 0x687   :  { %4332 = vrcp.f32 %v933_v30 }
 0x691   :  { %v4333_v32 = vpop.eup %4332 }
 0x692   :  { %v940_v33 = vmul.f32 %v4333_v32, %v938_v31 }
 0x694   :  { %942 = vrot.lane.b32.xlu0 %v940_v33, %s4434_s28 }
 0x6e6   :  { %v1135_v34 = vpop.permute.xlu1 %1134 }
 0x6e7   :  { %v1137_v35 = vmul.f32 %v4327_v25, %v1135_v34 }
 0x6e9   :  { %1139 = vrot.lane.b32.xlu1 %v1137_v35, %s4428_s17 }
 0x6f5   :  { %v949_v36 = vpop.permute.xlu1 %948 }
 0x6f6   :  { %v951_v37 = vmul.f32 %v4333_v32, %v949_v36  ;;  %v1129_v38 = vpop.permute.xlu0 %1128 }
 0x6f7   :  { %v1131_v39 = vadd.f32 %v1129_v38, %v4697_v45 }
 0x6f8   :  { %953 = vrot.lane.b32.xlu1 %v951_v37, %s4435_s29 }
 0x6f9   :  { %v1132_v40 = vmul.f32 %v4327_v25, %v1131_v39 }
 0x706   :  { %v943_v43 = vpop.permute.xlu0 %942 }
 0x707   :  { %v945_v44 = vadd.f32 %v943_v43, %v4709_v53  ;;  %v4782_v53 = vld [vmem:[%s5119_s1 + $0x18] sm:$0xff] }
 0x709   :  { %v946_v46 = vmul.f32 %v4333_v32, %v945_v44 }
 0x75b   :  { %v1140_v41 = vpop.permute.xlu1 %1139 }
 0x75c   :  { %v4762_v42 = vadd.f32 %v1140_v41, %v1132_v40 }
 0x75e   :  { %4334 = vtanh.f32 %v4762_v42  ;;  %3674 = vmatmul.mubr.msk.f32.vlgmr.msra.gmra.mrb[6].mxu0 %vm35_vm0, %v4762_v42 }
 0x75f   :  { %4104 = vmatpush1.bf16.msra.mxu0 %v4554_v22  ;;  %1549 = vmatprep.mubr.f32.mxu0 %v4427_v3 }
 0x760   :  { %4106 = vmatprep.subr.bf16.mxu0 %v4557_v23 }
 0x763   :  { %4108 = vmatpush1.bf16.msra.mxu0 %v4567_v26 }
 0x764   :  { %4122 = vmatprep.subr.bf16.mxu0 %v4500_v4 }
 0x768   :  { %v4335_v45 = vpop.eup %4334 }
 0x769   :  { %1145 = vrot.lane.b32.xlu0 %v4335_v45, %s4432_s4 }
 0x76a   :  { %v954_v47 = vpop.permute.xlu1 %953 }
 0x76b   :  { %v4774_v49 = vadd.f32 %v954_v47, %v946_v46 }
 0x76d   :  { %4336 = vtanh.f32 %v4774_v49 }
 0x777   :  { %v4337_v50 = vpop.eup %4336 }
 0x778   :  { %959 = vrot.lane.b32.xlu1 %v4337_v50, %s4429_s25 }
 0x7db   :  { %v1146_v51 = vpop.permute.xlu0 %1145 }
 0x7dc   :  { %v1148_v55 = vmul.f32 %v4327_v25, %v1146_v51 }
 0x7de   :  { %1150 = vrot.lane.b32.xlu0 %v1148_v55, %s4432_s4 }
 0x7e2   :  { %1566 = vrot.lane.b32.xlu0 %v4782_v53, %s4428_s17 }
 0x7e6   :  { %1380 = vrot.lane.b32.xlu0 %v4717_v59, %s4433_s14 }
 0x7ea   :  { %v960_v56 = vpop.permute.xlu1 %959 }
 0x7eb   :  { %v962_v57 = vmul.f32 %v4333_v32, %v960_v56 }
 0x7ed   :  { %1298 = vrot.lane.b32.xlu1 %v962_v57, %s4428_s17  ;;  %v3681_v57 = vld [vmem:[%s5120_s0 + $0x40] sm:$0xff] }
 0x850   :  { %v1151_v60 = vpop.permute.xlu0 %1150 }
 0x851   :  { %3868 = vmatmul.mubr.msk.f32.vlgmr.msra.gmra.mrb[4].mxu1 %vm35_vm0, %v1151_v60  ;;  %3675 = vmatmul.mubr.msk.f32.vlgmr.msra.gmra.mrb[6].mxu0 %vm35_vm0, %v1151_v60  ;;  %v3682_v60 = vld [vmem:[%s5120_s0 + $0x48] sm:$0xff] }
 0x852   :  { %4089 = vmatpush3.bf16.msra.mxu1 %v4642_v61  ;;  %3874 = vmatprep.mubr.msk.f32.mxu1 %vm4431_vm1, %v4427_v3 }
 0x853   :  { %4090 = vmatprep.subr.bf16.mxu1 %v4430_v48  ;;  %4124 = vmatpush1.bf16.msra.mxu0 %v4511_v8 }
 0x854   :  { %4126 = vmatprep.subr.bf16.mxu0 %v4513_v9  ;;  %1921 = vmatprep.mubr.f32.mxu0 %v4427_v3  ;;  %v1567_v19 = vpop.permute.xlu0 %1566 }
 0x857   :  { %4128 = vmatpush1.bf16.msra.mxu0 %v4529_v14 }
 0x858   :  { %4130 = vmatprep.subr.bf16.mxu0 %v4532_v15  ;;  %v1381_v28 = vpop.permute.xlu0 %1380 }
 0x859   :  { %3875 = vmatmul.mubr.msk.f32.vlgmr.msra.gmra.mrb[4].mxu1 %vm38_vm2, %v4774_v49 }
 0x85a   :  { %4092 = vmatpush3.bf16.msra.mxu1 %v4661_v2  ;;  %3881 = vmatprep.mubr.msk.f32.mxu1 %vm4431_vm1, %v4427_v3 }
 0x85b   :  { %4109 = vmatprep.subr.bf16.mxu1 %v4430_v48 }
 0x85f   :  { %v1299_v59 = vpop.permute.xlu1 %1298 }
 0x861   :  { %3882 = vmatmul.mubr.msk.f32.vlgmr.msra.gmra.mrb[4].mxu1 %vm38_vm2, %v1299_v59 }
 0x862   :  { %4111 = vmatpush3.bf16.msra.mxu1 %v4604_v52  ;;  %3892 = vmatprep.mubr.msk.f32.mxu1 %vm4431_vm1, %v4427_v3 }
 0x863   :  { %4112 = vmatprep.subr.bf16.mxu1 %v4430_v48 }
 0x866   :  { %4114 = vmatpush3.bf16.msra.mxu1 %v4614_v54 }
 0x867   :  { %4115 = vmatprep.subr.bf16.mxu1 %v4430_v48 }
 0x924   :  { %v1551_v58 = vpop.f32.mrb[6].mxu0 }
 0x925   :  { %v1556_v0 = vadd.f32 %v3671_v62, %v1551_v58  ;;  %v1553_v1 = vpop.f32.mrb[7].mxu0 }
 0x926   :  { %v1557_v5 = vadd.f32 %v3672_v63, %v1553_v1 }
 0x927   :  { %v3676_v6 = vmul.f32 -1.442695, %v1556_v0 }
 0x928   :  { %4338 = vtanh.f32 %v1557_v5 }
 0x929   :  { %4340 = vpow2.f32 %v3676_v6 }
 0x932   :  { %v4339_v7 = vpop.eup %4338 }
 0x933   :  { %v4341_v10 = vpop.eup %4340  ;;  %1577 = vrot.lane.b32.xlu1 %v4339_v7, %s4429_s25 }
 0x934   :  { %v1561_v11 = vadd.f32 1.0, %v4341_v10  ;;  %v1368_v12 = vpop.f32.mrb[4].mxu1 }
 0x935   :  { %v4235_v13 = vadd.f32 %v4687_v18, %v1368_v12  ;;  %v3883_v16 = vpop.f32.mrb[5].mxu1 }
 0x936   :  { %4342 = vrcp.f32 %v1561_v11 }
 0x937   :  { %v3670_v17 = vmul.f32 -1.442695, %v4235_v13  ;;  %4344 = vtanh.f32 %v4235_v13 }
 0x939   :  { %4346 = vpow2.f32 %v3670_v17 }
 0x940   :  { %v4343_v20 = vpop.eup %4342 }
 0x941   :  { %v4345_v21 = vpop.eup %4344  ;;  %v1569_v24 = vmul.f32 %v4343_v20, %v1567_v19 }
 0x942   :  { %1391 = vrot.lane.b32.xlu1 %v4345_v21, %s4434_s28 }
 0x943   :  { %v4347_v25 = vpop.eup %4346  ;;  %1571 = vrot.lane.b32.xlu0 %v1569_v24, %s4429_s25 }
 0x944   :  { %v1376_v27 = vadd.f32 1.0, %v4347_v25 }
 0x946   :  { %4348 = vrcp.f32 %v1376_v27 }
 0x950   :  { %v4349_v29 = vpop.eup %4348 }
 0x951   :  { %v1383_v30 = vmul.f32 %v4349_v29, %v1381_v28 }
 0x953   :  { %1385 = vrot.lane.b32.xlu0 %v1383_v30, %s4434_s28 }
 0x9a5   :  { %v1578_v31 = vpop.permute.xlu1 %1577 }
 0x9a6   :  { %v1580_v32 = vmul.f32 %v4343_v20, %v1578_v31 }
 0x9a8   :  { %1582 = vrot.lane.b32.xlu1 %v1580_v32, %s4428_s17 }
 0x9b4   :  { %v1392_v33 = vpop.permute.xlu1 %1391 }
 0x9b5   :  { %v1394_v34 = vmul.f32 %v4349_v29, %v1392_v33  ;;  %v1572_v35 = vpop.permute.xlu0 %1571 }
 0x9b6   :  { %v1574_v36 = vadd.f32 %v1572_v35, %v4762_v42 }
 0x9b7   :  { %1396 = vrot.lane.b32.xlu1 %v1394_v34, %s4435_s29 }
 0x9b8   :  { %v1575_v37 = vmul.f32 %v4343_v20, %v1574_v36 }
 0x9c5   :  { %v1386_v40 = vpop.permute.xlu0 %1385 }
 0x9c6   :  { %v1388_v41 = vadd.f32 %v1386_v40, %v4774_v49  ;;  %v4847_v49 = vld [vmem:[%s5119_s1 + $0x20] sm:$0xff] }
 0x9c8   :  { %v1389_v43 = vmul.f32 %v4349_v29, %v1388_v41 }
 0xa1a   :  { %v1583_v38 = vpop.permute.xlu1 %1582 }
 0xa1b   :  { %v4827_v39 = vadd.f32 %v1583_v38, %v1575_v37 }
 0xa1d   :  { %4350 = vtanh.f32 %v4827_v39  ;;  %3684 = vmatmul.mubr.msk.f32.vlgmr.msra.gmra.mrb[8].mxu0 %vm35_vm0, %v4827_v39 }
 0xa1e   :  { %4132 = vmatpush1.bf16.msra.mxu0 %v4554_v22  ;;  %1992 = vmatprep.mubr.f32.mxu0 %v4427_v3 }
 0xa1f   :  { %4134 = vmatprep.subr.bf16.mxu0 %v4557_v23 }
 0xa22   :  { %4136 = vmatpush1.bf16.msra.mxu0 %v4567_v26 }
 0xa23   :  { %4150 = vmatprep.subr.bf16.mxu0 %v4500_v4 }
 0xa27   :  { %v4351_v42 = vpop.eup %4350 }
 0xa28   :  { %1588 = vrot.lane.b32.xlu0 %v4351_v42, %s4432_s4 }
 0xa29   :  { %v1397_v44 = vpop.permute.xlu1 %1396 }
 0xa2a   :  { %v4839_v45 = vadd.f32 %v1397_v44, %v1389_v43 }
 0xa2c   :  { %4352 = vtanh.f32 %v4839_v45 }
 0xa36   :  { %v4353_v46 = vpop.eup %4352 }
 0xa37   :  { %1402 = vrot.lane.b32.xlu1 %v4353_v46, %s4429_s25 }
 0xa9a   :  { %v1589_v47 = vpop.permute.xlu0 %1588 }
 0xa9b   :  { %v1591_v50 = vmul.f32 %v4343_v20, %v1589_v47 }
 0xa9d   :  { %1593 = vrot.lane.b32.xlu0 %v1591_v50, %s4432_s4 }
 0xaa1   :  { %2009 = vrot.lane.b32.xlu0 %v4847_v49, %s4428_s17 }
 0xaa5   :  { %1823 = vrot.lane.b32.xlu0 %v4782_v53, %s4433_s14 }
 0xaa9   :  { %v1403_v51 = vpop.permute.xlu1 %1402 }
 0xaaa   :  { %v1405_v55 = vmul.f32 %v4349_v29, %v1403_v51 }
 0xaac   :  { %1741 = vrot.lane.b32.xlu1 %v1405_v55, %s4428_s17  ;;  %v3691_v55 = vld [vmem:[%s5120_s0 + $0x50] sm:$0xff] }
 0xb0f   :  { %v1594_v56 = vpop.permute.xlu0 %1593 }
 0xb10   :  { %3893 = vmatmul.mubr.msk.f32.vlgmr.msra.gmra.mrb[6].mxu1 %vm35_vm0, %v1594_v56  ;;  %3685 = vmatmul.mubr.msk.f32.vlgmr.msra.gmra.mrb[8].mxu0 %vm35_vm0, %v1594_v56  ;;  %v3692_v56 = vld [vmem:[%s5120_s0 + $0x58] sm:$0xff] }
 0xb11   :  { %4117 = vmatpush3.bf16.msra.mxu1 %v4642_v61  ;;  %3899 = vmatprep.mubr.msk.f32.mxu1 %vm4431_vm1, %v4427_v3 }
 0xb12   :  { %4118 = vmatprep.subr.bf16.mxu1 %v4430_v48  ;;  %4152 = vmatpush1.bf16.msra.mxu0 %v4511_v8 }
 0xb13   :  { %4154 = vmatprep.subr.bf16.mxu0 %v4513_v9  ;;  %2364 = vmatprep.mubr.f32.mxu0 %v4427_v3  ;;  %v2010_v13 = vpop.permute.xlu0 %2009 }
 0xb16   :  { %4156 = vmatpush1.bf16.msra.mxu0 %v4529_v14 }
 0xb17   :  { %4158 = vmatprep.subr.bf16.mxu0 %v4532_v15  ;;  %v1824_v24 = vpop.permute.xlu0 %1823 }
 0xb18   :  { %3900 = vmatmul.mubr.msk.f32.vlgmr.msra.gmra.mrb[6].mxu1 %vm38_vm2, %v4839_v45 }
 0xb19   :  { %4120 = vmatpush3.bf16.msra.mxu1 %v4661_v2  ;;  %3906 = vmatprep.mubr.msk.f32.mxu1 %vm4431_vm1, %v4427_v3 }
 0xb1a   :  { %4137 = vmatprep.subr.bf16.mxu1 %v4430_v48 }
 0xb1e   :  { %v1742_v53 = vpop.permute.xlu1 %1741 }
 0xb20   :  { %3907 = vmatmul.mubr.msk.f32.vlgmr.msra.gmra.mrb[6].mxu1 %vm38_vm2, %v1742_v53 }
 0xb21   :  { %4139 = vmatpush3.bf16.msra.mxu1 %v4604_v52  ;;  %3917 = vmatprep.mubr.msk.f32.mxu1 %vm4431_vm1, %v4427_v3 }
 0xb22   :  { %4140 = vmatprep.subr.bf16.mxu1 %v4430_v48 }
 0xb25   :  { %4142 = vmatpush3.bf16.msra.mxu1 %v4614_v54 }
 0xb26   :  { %4143 = vmatprep.subr.bf16.mxu1 %v4430_v48 }
 0xbe3   :  { %v1994_v59 = vpop.f32.mrb[8].mxu0 }
 0xbe4   :  { %v1999_v62 = vadd.f32 %v3681_v57, %v1994_v59  ;;  %v1996_v63 = vpop.f32.mrb[9].mxu0 }
 0xbe5   :  { %v2000_v58 = vadd.f32 %v3682_v60, %v1996_v63 }
 0xbe6   :  { %v3686_v0 = vmul.f32 -1.442695, %v1999_v62 }
 0xbe7   :  { %4354 = vtanh.f32 %v2000_v58 }
 0xbe8   :  { %4356 = vpow2.f32 %v3686_v0 }
 0xbf1   :  { %v4355_v1 = vpop.eup %4354 }
 0xbf2   :  { %v4357_v5 = vpop.eup %4356  ;;  %2020 = vrot.lane.b32.xlu1 %v4355_v1, %s4429_s25 }
 0xbf3   :  { %v2004_v6 = vadd.f32 1.0, %v4357_v5  ;;  %v1811_v7 = vpop.f32.mrb[6].mxu1 }
 0xbf4   :  { %v4236_v10 = vadd.f32 %v4687_v18, %v1811_v7  ;;  %v3908_v11 = vpop.f32.mrb[7].mxu1 }
 0xbf5   :  { %4358 = vrcp.f32 %v2004_v6 }
 0xbf6   :  { %v3680_v12 = vmul.f32 -1.442695, %v4236_v10  ;;  %4360 = vtanh.f32 %v4236_v10 }
 0xbf8   :  { %4362 = vpow2.f32 %v3680_v12 }
 0xbff   :  { %v4359_v16 = vpop.eup %4358 }
 0xc00   :  { %v4361_v17 = vpop.eup %4360  ;;  %v2012_v19 = vmul.f32 %v4359_v16, %v2010_v13 }
 0xc01   :  { %1834 = vrot.lane.b32.xlu1 %v4361_v17, %s4434_s28 }
 0xc02   :  { %v4363_v20 = vpop.eup %4362  ;;  %2014 = vrot.lane.b32.xlu0 %v2012_v19, %s4429_s25 }
 0xc03   :  { %v1819_v21 = vadd.f32 1.0, %v4363_v20 }
 0xc05   :  { %4364 = vrcp.f32 %v1819_v21 }
 0xc0f   :  { %v4365_v25 = vpop.eup %4364 }
 0xc10   :  { %v1826_v27 = vmul.f32 %v4365_v25, %v1824_v24 }
 0xc12   :  { %1828 = vrot.lane.b32.xlu0 %v1826_v27, %s4434_s28 }
 0xc64   :  { %v2021_v28 = vpop.permute.xlu1 %2020 }
 0xc65   :  { %v2023_v29 = vmul.f32 %v4359_v16, %v2021_v28 }
 0xc67   :  { %2025 = vrot.lane.b32.xlu1 %v2023_v29, %s4428_s17 }
 0xc73   :  { %v1835_v30 = vpop.permute.xlu1 %1834 }
 0xc74   :  { %v1837_v31 = vmul.f32 %v4365_v25, %v1835_v30  ;;  %v2015_v32 = vpop.permute.xlu0 %2014 }
 0xc75   :  { %v2017_v33 = vadd.f32 %v2015_v32, %v4827_v39 }
 0xc76   :  { %1839 = vrot.lane.b32.xlu1 %v1837_v31, %s4435_s29 }
 0xc77   :  { %v2018_v34 = vmul.f32 %v4359_v16, %v2017_v33 }
 0xc84   :  { %v1829_v37 = vpop.permute.xlu0 %1828 }
 0xc85   :  { %v1831_v38 = vadd.f32 %v1829_v37, %v4839_v45  ;;  %v4912_v45 = vld [vmem:[%s5119_s1 + $0x28] sm:$0xff] }
 0xc87   :  { %v1832_v40 = vmul.f32 %v4365_v25, %v1831_v38 }
 0xcd9   :  { %v2026_v35 = vpop.permute.xlu1 %2025 }
 0xcda   :  { %v4892_v36 = vadd.f32 %v2026_v35, %v2018_v34 }
 0xcdc   :  { %4366 = vtanh.f32 %v4892_v36  ;;  %3694 = vmatmul.mubr.msk.f32.vlgmr.msra.gmra.mrb[10].mxu0 %vm35_vm0, %v4892_v36 }
 0xcdd   :  { %4160 = vmatpush1.bf16.msra.mxu0 %v4554_v22  ;;  %2435 = vmatprep.mubr.f32.mxu0 %v4427_v3 }
 0xcde   :  { %4162 = vmatprep.subr.bf16.mxu0 %v4557_v23 }
 0xce1   :  { %4164 = vmatpush1.bf16.msra.mxu0 %v4567_v26 }
 0xce2   :  { %4178 = vmatprep.subr.bf16.mxu0 %v4500_v4 }
 0xce6   :  { %v4367_v39 = vpop.eup %4366 }
 0xce7   :  { %2031 = vrot.lane.b32.xlu0 %v4367_v39, %s4432_s4 }
 0xce8   :  { %v1840_v41 = vpop.permute.xlu1 %1839 }
 0xce9   :  { %v4904_v42 = vadd.f32 %v1840_v41, %v1832_v40 }
 0xceb   :  { %4368 = vtanh.f32 %v4904_v42 }
 0xcf5   :  { %v4369_v43 = vpop.eup %4368 }
 0xcf6   :  { %1845 = vrot.lane.b32.xlu1 %v4369_v43, %s4429_s25 }
 0xd59   :  { %v2032_v44 = vpop.permute.xlu0 %2031 }
 0xd5a   :  { %v2034_v46 = vmul.f32 %v4359_v16, %v2032_v44 }
 0xd5c   :  { %2036 = vrot.lane.b32.xlu0 %v2034_v46, %s4432_s4 }
 0xd60   :  { %2452 = vrot.lane.b32.xlu0 %v4912_v45, %s4428_s17 }
 0xd64   :  { %2266 = vrot.lane.b32.xlu0 %v4847_v49, %s4433_s14 }
 0xd68   :  { %v1846_v47 = vpop.permute.xlu1 %1845 }
 0xd69   :  { %v1848_v50 = vmul.f32 %v4365_v25, %v1846_v47 }
 0xd6b   :  { %2184 = vrot.lane.b32.xlu1 %v1848_v50, %s4428_s17 }
 0xdce   :  { %v2037_v51 = vpop.permute.xlu0 %2036 }
 0xdcf   :  { %3918 = vmatmul.mubr.msk.f32.vlgmr.msra.gmra.mrb[8].mxu1 %vm35_vm0, %v2037_v51  ;;  %3695 = vmatmul.mubr.msk.f32.vlgmr.msra.gmra.mrb[10].mxu0 %vm35_vm0, %v2037_v51 }
 0xdd0   :  { %4145 = vmatpush3.bf16.msra.mxu1 %v4642_v61  ;;  %3924 = vmatprep.mubr.msk.f32.mxu1 %vm4431_vm1, %v4427_v3 }
 0xdd1   :  { %4146 = vmatprep.subr.bf16.mxu1 %v4430_v48  ;;  %4180 = vmatpush1.bf16.msra.mxu0 %v4511_v8 }
 0xdd2   :  { %4182 = vmatprep.subr.bf16.mxu0 %v4513_v9  ;;  %2807 = vmatprep.mubr.f32.mxu0 %v4427_v3  ;;  %v2453_v10 = vpop.permute.xlu0 %2452 }
 0xdd5   :  { %4184 = vmatpush1.bf16.msra.mxu0 %v4529_v14 }
 0xdd6   :  { %4186 = vmatprep.subr.bf16.mxu0 %v4532_v15  ;;  %v2267_v19 = vpop.permute.xlu0 %2266 }
 0xdd7   :  { %3925 = vmatmul.mubr.msk.f32.vlgmr.msra.gmra.mrb[8].mxu1 %vm38_vm2, %v4904_v42 }
 0xdd8   :  { %4148 = vmatpush3.bf16.msra.mxu1 %v4661_v2  ;;  %3931 = vmatprep.mubr.msk.f32.mxu1 %vm4431_vm1, %v4427_v3 }
 0xdd9   :  { %4165 = vmatprep.subr.bf16.mxu1 %v4430_v48 }
 0xddd   :  { %v2185_v49 = vpop.permute.xlu1 %2184 }
 0xddf   :  { %3932 = vmatmul.mubr.msk.f32.vlgmr.msra.gmra.mrb[8].mxu1 %vm38_vm2, %v2185_v49 }
 0xde0   :  { %4167 = vmatpush3.bf16.msra.mxu1 %v4604_v52  ;;  %3942 = vmatprep.mubr.msk.f32.mxu1 %vm4431_vm1, %v4427_v3 }
 0xde1   :  { %4168 = vmatprep.subr.bf16.mxu1 %v4430_v48 }
 0xde4   :  { %4170 = vmatpush3.bf16.msra.mxu1 %v4614_v54 }
 0xde5   :  { %4171 = vmatprep.subr.bf16.mxu1 %v4430_v48 }
 0xea2   :  { %v2437_v53 = vpop.f32.mrb[10].mxu0 }
 0xea3   :  { %v2442_v57 = vadd.f32 %v3691_v55, %v2437_v53  ;;  %v2439_v60 = vpop.f32.mrb[11].mxu0 }
 0xea4   :  { %v2443_v59 = vadd.f32 %v3692_v56, %v2439_v60 }
 0xea5   :  { %v3696_v62 = vmul.f32 -1.442695, %v2442_v57 }
 0xea6   :  { %4370 = vtanh.f32 %v2443_v59 }
 0xea7   :  { %4372 = vpow2.f32 %v3696_v62 }
 0xeb0   :  { %v4371_v63 = vpop.eup %4370 }
 0xeb1   :  { %v4373_v58 = vpop.eup %4372  ;;  %2463 = vrot.lane.b32.xlu1 %v4371_v63, %s4429_s25 }
 0xeb2   :  { %v2447_v0 = vadd.f32 1.0, %v4373_v58  ;;  %v2254_v1 = vpop.f32.mrb[8].mxu1 }
 0xeb3   :  { %v4237_v5 = vadd.f32 %v4687_v18, %v2254_v1  ;;  %v3933_v6 = vpop.f32.mrb[9].mxu1 }
 0xeb4   :  { %4374 = vrcp.f32 %v2447_v0 }
 0xeb5   :  { %v3690_v7 = vmul.f32 -1.442695, %v4237_v5  ;;  %4376 = vtanh.f32 %v4237_v5 }
 0xeb7   :  { %4378 = vpow2.f32 %v3690_v7 }
 0xebe   :  { %v4375_v11 = vpop.eup %4374 }
 0xebf   :  { %v4377_v12 = vpop.eup %4376  ;;  %v2455_v13 = vmul.f32 %v4375_v11, %v2453_v10 }
 0xec0   :  { %2277 = vrot.lane.b32.xlu1 %v4377_v12, %s4434_s28 }
 0xec1   :  { %v4379_v16 = vpop.eup %4378  ;;  %2457 = vrot.lane.b32.xlu0 %v2455_v13, %s4429_s25 }
 0xec2   :  { %v2262_v17 = vadd.f32 1.0, %v4379_v16 }
 0xec4   :  { %4380 = vrcp.f32 %v2262_v17 }
 0xece   :  { %v4381_v20 = vpop.eup %4380 }
 0xecf   :  { %v2269_v21 = vmul.f32 %v4381_v20, %v2267_v19 }
 0xed1   :  { %2271 = vrot.lane.b32.xlu0 %v2269_v21, %s4434_s28 }
 0xf23   :  { %v2464_v24 = vpop.permute.xlu1 %2463 }
 0xf24   :  { %v2466_v25 = vmul.f32 %v4375_v11, %v2464_v24 }
 0xf26   :  { %2468 = vrot.lane.b32.xlu1 %v2466_v25, %s4428_s17 }
 0xf32   :  { %v2278_v27 = vpop.permute.xlu1 %2277 }
 0xf33   :  { %v2280_v28 = vmul.f32 %v4381_v20, %v2278_v27  ;;  %v2458_v29 = vpop.permute.xlu0 %2457 }
 0xf34   :  { %v2460_v30 = vadd.f32 %v2458_v29, %v4892_v36 }
 0xf35   :  { %2282 = vrot.lane.b32.xlu1 %v2280_v28, %s4435_s29 }
 0xf36   :  { %v2461_v31 = vmul.f32 %v4375_v11, %v2460_v30 }
 0xf43   :  { %v2272_v34 = vpop.permute.xlu0 %2271 }
 0xf44   :  { %v2274_v35 = vadd.f32 %v2272_v34, %v4904_v42 }
 0xf46   :  { %v2275_v37 = vmul.f32 %v4381_v20, %v2274_v35 }
 0xf98   :  { %v2469_v32 = vpop.permute.xlu1 %2468 }
 0xf99   :  { %v4957_v33 = vadd.f32 %v2469_v32, %v2461_v31 }
 0xf9b   :  { %4382 = vtanh.f32 %v4957_v33  ;;  %3704 = vmatmul.mubr.msk.f32.vlgmr.msra.gmra.mrb[12].mxu0 %vm35_vm0, %v4957_v33 }
 0xf9c   :  { %4188 = vmatpush1.bf16.msra.mxu0 %v4554_v22  ;;  %2878 = vmatprep.mubr.f32.mxu0 %v4427_v3 }
 0xf9d   :  { %4190 = vmatprep.subr.bf16.mxu0 %v4557_v23 }
 0xfa0   :  { %4192 = vmatpush1.bf16.msra.mxu0 %v4567_v26 }
 0xfa1   :  { %4206 = vmatprep.subr.bf16.mxu0 %v4500_v4  ;;  %v4977_v4 = vld [vmem:[%s5119_s1 + $0x30] sm:$0xff] }
 0xfa5   :  { %v4383_v36 = vpop.eup %4382 }
 0xfa6   :  { %2474 = vrot.lane.b32.xlu0 %v4383_v36, %s4432_s4  ;;  %v3711_v36 = vld [vmem:[%s5120_s0 + $0x70] sm:$0xff] }
 0xfa7   :  { %v2283_v38 = vpop.permute.xlu1 %2282 }
 0xfa8   :  { %v4969_v39 = vadd.f32 %v2283_v38, %v2275_v37  ;;  %v3712_v37 = vld [vmem:[%s5120_s0 + $0x78] sm:$0xff] }
 0xfaa   :  { %4384 = vtanh.f32 %v4969_v39 }
 0xfb4   :  { %v4385_v40 = vpop.eup %4384 }
 0xfb5   :  { %2288 = vrot.lane.b32.xlu1 %v4385_v40, %s4429_s25 }
0x1018   :  { %v2475_v41 = vpop.permute.xlu0 %2474 }
0x1019   :  { %v2477_v43 = vmul.f32 %v4375_v11, %v2475_v41 }
0x101b   :  { %2479 = vrot.lane.b32.xlu0 %v2477_v43, %s4432_s4 }
0x101f   :  { %2895 = vrot.lane.b32.xlu0 %v4977_v4, %s4428_s17 }
0x1023   :  { %2709 = vrot.lane.b32.xlu0 %v4912_v45, %s4433_s14 }
0x1027   :  { %v2289_v42 = vpop.permute.xlu1 %2288 }
0x1028   :  { %v2291_v44 = vmul.f32 %v4381_v20, %v2289_v42 }
0x102a   :  { %2627 = vrot.lane.b32.xlu1 %v2291_v44, %s4428_s17  ;;  %v4426_v44 = vld [vmem:[%s5124_s5] ss:$0 sm:$0xff] }
0x108d   :  { %v2480_v46 = vpop.permute.xlu0 %2479 }
0x108e   :  { %3943 = vmatmul.mubr.msk.f32.vlgmr.msra.gmra.mrb[10].mxu1 %vm35_vm0, %v2480_v46  ;;  %3705 = vmatmul.mubr.msk.f32.vlgmr.msra.gmra.mrb[12].mxu0 %vm35_vm0, %v2480_v46 }
0x108f   :  { %4173 = vmatpush3.bf16.msra.mxu1 %v4642_v61  ;;  %3949 = vmatprep.mubr.msk.f32.mxu1 %vm4431_vm1, %v4427_v3 }
0x1090   :  { %4174 = vmatprep.subr.bf16.mxu1 %v4430_v48  ;;  %4208 = vmatpush1.bf16.msra.mxu0 %v4511_v8  ;;  %v3701_v8 = vld [vmem:[%s5120_s0 + $0x60] sm:$0xff] }
0x1091   :  { %4210 = vmatprep.subr.bf16.mxu0 %v4513_v9  ;;  %3250 = vmatprep.mubr.f32.mxu0 %v4427_v3  ;;  %v3702_v9 = vld [vmem:[%s5120_s0 + $0x68] sm:$0xff]  ;;  %v2896_v62 = vpop.permute.xlu0 %2895 }
0x1094   :  { %4212 = vmatpush1.bf16.msra.mxu0 %v4529_v14 }
0x1095   :  { %4214 = vmatprep.subr.bf16.mxu0 %v4532_v15  ;;  %v2710_v6 = vpop.permute.xlu0 %2709 }
0x1096   :  { %3950 = vmatmul.mubr.msk.f32.vlgmr.msra.gmra.mrb[10].mxu1 %vm38_vm2, %v4969_v39 }
0x1097   :  { %4176 = vmatpush3.bf16.msra.mxu1 %v4661_v2  ;;  %3956 = vmatprep.mubr.msk.f32.mxu1 %vm4431_vm1, %v4427_v3 }
0x1098   :  { %4193 = vmatprep.subr.bf16.mxu1 %v4430_v48 }
0x109c   :  { %v2628_v45 = vpop.permute.xlu1 %2627 }
0x109e   :  { %3957 = vmatmul.mubr.msk.f32.vlgmr.msra.gmra.mrb[10].mxu1 %vm38_vm2, %v2628_v45 }
0x109f   :  { %4195 = vmatpush3.bf16.msra.mxu1 %v4604_v52  ;;  %3967 = vmatprep.mubr.msk.f32.mxu1 %vm4431_vm1, %v4427_v3 }
0x10a0   :  { %4196 = vmatprep.subr.bf16.mxu1 %v4430_v48 }
0x10a3   :  { %4198 = vmatpush3.bf16.msra.mxu1 %v4614_v54 }
0x10a4   :  { %4199 = vmatprep.subr.bf16.mxu1 %v4430_v48 }
0x1161   :  { %v2880_v14 = vpop.f32.mrb[12].mxu0 }
0x1162   :  { %v2885_v15 = vadd.f32 %v3701_v8, %v2880_v14  ;;  %v2882_v47 = vpop.f32.mrb[13].mxu0 }
0x1163   :  { %v2886_v50 = vadd.f32 %v3702_v9, %v2882_v47 }
0x1164   :  { %v3706_v51 = vmul.f32 -1.442695, %v2885_v15 }
0x1165   :  { %4386 = vtanh.f32 %v2886_v50 }
0x1166   :  { %4388 = vpow2.f32 %v3706_v51 }
0x116f   :  { %v4387_v49 = vpop.eup %4386 }
0x1170   :  { %v4389_v55 = vpop.eup %4388  ;;  %2906 = vrot.lane.b32.xlu1 %v4387_v49, %s4429_s25 }
0x1171   :  { %v2890_v56 = vadd.f32 1.0, %v4389_v55  ;;  %v2697_v53 = vpop.f32.mrb[10].mxu1 }
0x1172   :  { %v4238_v57 = vadd.f32 %v4687_v18, %v2697_v53  ;;  %v3958_v60 = vpop.f32.mrb[11].mxu1 }
0x1173   :  { %4390 = vrcp.f32 %v2890_v56 }
0x1174   :  { %v3700_v59 = vmul.f32 -1.442695, %v4238_v57  ;;  %4392 = vtanh.f32 %v4238_v57 }
0x1176   :  { %4394 = vpow2.f32 %v3700_v59 }
0x117d   :  { %v4391_v63 = vpop.eup %4390 }
0x117e   :  { %v4393_v58 = vpop.eup %4392  ;;  %v2898_v0 = vmul.f32 %v4391_v63, %v2896_v62 }
0x117f   :  { %2720 = vrot.lane.b32.xlu1 %v4393_v58, %s4434_s28 }
0x1180   :  { %v4395_v1 = vpop.eup %4394  ;;  %2900 = vrot.lane.b32.xlu0 %v2898_v0, %s4429_s25 }
0x1181   :  { %v2705_v5 = vadd.f32 1.0, %v4395_v1 }
0x1183   :  { %4396 = vrcp.f32 %v2705_v5 }
0x118d   :  { %v4397_v7 = vpop.eup %4396 }
0x118e   :  { %v2712_v10 = vmul.f32 %v4397_v7, %v2710_v6 }
0x1190   :  { %2714 = vrot.lane.b32.xlu0 %v2712_v10, %s4434_s28 }
0x11e2   :  { %v2907_v18 = vpop.permute.xlu1 %2906 }
0x11e3   :  { %v2909_v11 = vmul.f32 %v4391_v63, %v2907_v18 }
0x11e5   :  { %2911 = vrot.lane.b32.xlu1 %v2909_v11, %s4428_s17 }
0x11f1   :  { %v2721_v12 = vpop.permute.xlu1 %2720 }
0x11f2   :  { %v2723_v13 = vmul.f32 %v4397_v7, %v2721_v12  ;;  %v2901_v16 = vpop.permute.xlu0 %2900 }
0x11f3   :  { %v2903_v17 = vadd.f32 %v2901_v16, %v4957_v33 }
0x11f4   :  { %2725 = vrot.lane.b32.xlu1 %v2723_v13, %s4435_s29 }
0x11f5   :  { %v2904_v19 = vmul.f32 %v4391_v63, %v2903_v17 }
0x1202   :  { %v2715_v24 = vpop.permute.xlu0 %2714 }
0x1203   :  { %v2717_v25 = vadd.f32 %v2715_v24, %v4969_v39 }
0x1205   :  { %v2718_v28 = vmul.f32 %v4397_v7, %v2717_v25 }
0x1257   :  { %v2912_v20 = vpop.permute.xlu1 %2911 }
0x1258   :  { %v5022_v21 = vadd.f32 %v2912_v20, %v2904_v19 }
0x125a   :  { %4398 = vtanh.f32 %v5022_v21  ;;  %3714 = vmatmul.mubr.msk.f32.vlgmr.msra.gmra.mrb[14].mxu0 %vm35_vm0, %v5022_v21 }
0x125b   :  { %4216 = vmatpush1.bf16.msra.mxu0 %v4554_v22  ;;  %3321 = vmatprep.mubr.f32.mxu0 %v4427_v3 }
0x125c   :  { %4218 = vmatprep.subr.bf16.mxu0 %v4557_v23  ;;  %v5041_v23 = vld [vmem:[%s5119_s1 + $0x38] sm:$0xff] }
0x125f   :  { %4220 = vmatpush1.bf16.msra.mxu0 %v4567_v26 }
0x1264   :  { %v4399_v27 = vpop.eup %4398 }
0x1265   :  { %2917 = vrot.lane.b32.xlu0 %v4399_v27, %s4432_s4 }
0x1266   :  { %v2726_v29 = vpop.permute.xlu1 %2725 }
0x1267   :  { %v5033_v30 = vadd.f32 %v2726_v29, %v2718_v28 }
0x1269   :  { %4400 = vtanh.f32 %v5033_v30 }
0x1273   :  { %v4401_v31 = vpop.eup %4400 }
0x1274   :  { %2731 = vrot.lane.b32.xlu1 %v4401_v31, %s4429_s25 }
0x12d7   :  { %v2918_v22 = vpop.permute.xlu0 %2917 }
0x12d8   :  { %v2920_v32 = vmul.f32 %v4391_v63, %v2918_v22 }
0x12da   :  { %2922 = vrot.lane.b32.xlu0 %v2920_v32, %s4432_s4 }
0x12de   :  { %3338 = vrot.lane.b32.xlu0 %v5041_v23, %s4428_s17 }
0x12e2   :  { %3152 = vrot.lane.b32.xlu0 %v4977_v4, %s4433_s14 }
0x12e6   :  { %v2732_v26 = vpop.permute.xlu1 %2731 }
0x12e7   :  { %v2734_v33 = vmul.f32 %v4397_v7, %v2732_v26 }
0x12e9   :  { %3070 = vrot.lane.b32.xlu1 %v2734_v33, %s4428_s17 }
0x134c   :  { %v2923_v34 = vpop.permute.xlu0 %2922 }
0x134d   :  { %3968 = vmatmul.mubr.msk.f32.vlgmr.msra.gmra.mrb[12].mxu1 %vm35_vm0, %v2923_v34  ;;  %3715 = vmatmul.mubr.msk.f32.vlgmr.msra.gmra.mrb[14].mxu0 %vm35_vm0, %v2923_v34 }
0x134e   :  { %4201 = vmatpush3.bf16.msra.mxu1 %v4642_v61  ;;  %3974 = vmatprep.mubr.msk.f32.mxu1 %vm4431_vm1, %v4427_v3 }
0x134f   :  { %4202 = vmatprep.subr.bf16.mxu1 %v4430_v48 }
0x1350   :  { %v3339_v9 = vpop.permute.xlu0 %3338 }
0x1354   :  { %v3153_v49 = vpop.permute.xlu0 %3152 }
0x1355   :  { %3975 = vmatmul.mubr.msk.f32.vlgmr.msra.gmra.mrb[12].mxu1 %vm38_vm2, %v5033_v30 }
0x1356   :  { %4204 = vmatpush3.bf16.msra.mxu1 %v4661_v2  ;;  %3981 = vmatprep.mubr.msk.f32.mxu1 %vm4431_vm1, %v4427_v3 }
0x1357   :  { %4221 = vmatprep.subr.bf16.mxu1 %v4430_v48 }
0x135b   :  { %v3071_v35 = vpop.permute.xlu1 %3070 }
0x135d   :  { %3982 = vmatmul.mubr.msk.f32.vlgmr.msra.gmra.mrb[12].mxu1 %vm38_vm2, %v3071_v35 }
0x135e   :  { %4223 = vmatpush3.bf16.msra.mxu1 %v4604_v52  ;;  %3992 = vmatprep.mubr.msk.f32.mxu1 %vm4431_vm1, %v4427_v3 }
0x135f   :  { %4224 = vmatprep.subr.bf16.mxu1 %v4430_v48 }
0x1362   :  { %4226 = vmatpush3.bf16.msra.mxu1 %v4614_v54 }
0x1363   :  { %4227 = vmatprep.subr.bf16.mxu1 %v4430_v48 }
0x1420   :  { %v3323_v38 = vpop.f32.mrb[14].mxu0 }
0x1421   :  { %v3328_v39 = vadd.f32 %v3711_v36, %v3323_v38  ;;  %v3325_v52 = vpop.f32.mrb[15].mxu0 }
0x1422   :  { %v3329_v40 = vadd.f32 %v3712_v37, %v3325_v52 }
0x1423   :  { %v3716_v41 = vmul.f32 -1.442695, %v3328_v39 }
0x1424   :  { %4402 = vtanh.f32 %v3329_v40 }
0x1425   :  { %4404 = vpow2.f32 %v3716_v41 }
0x142e   :  { %v4403_v43 = vpop.eup %4402 }
0x142f   :  { %v4405_v4 = vpop.eup %4404  ;;  %3349 = vrot.lane.b32.xlu1 %v4403_v43, %s4429_s25 }
0x1430   :  { %v3333_v54 = vadd.f32 1.0, %v4405_v4  ;;  %v3140_v42 = vpop.f32.mrb[12].mxu1 }
0x1431   :  { %v4239_v46 = vadd.f32 %v4426_v44, %v3140_v42  ;;  %v3983_v45 = vpop.f32.mrb[13].mxu1 }
0x1432   :  { %4406 = vrcp.f32 %v3333_v54 }
0x1433   :  { %v3710_v8 = vmul.f32 -1.442695, %v4239_v46  ;;  %4408 = vtanh.f32 %v4239_v46 }
0x1435   :  { %4410 = vpow2.f32 %v3710_v8 }
0x143c   :  { %v4407_v14 = vpop.eup %4406 }
0x143d   :  { %v4409_v15 = vpop.eup %4408  ;;  %v3341_v47 = vmul.f32 %v4407_v14, %v3339_v9 }
0x143e   :  { %3163 = vrot.lane.b32.xlu1 %v4409_v15, %s4434_s28 }
0x143f   :  { %v4411_v50 = vpop.eup %4410  ;;  %3343 = vrot.lane.b32.xlu0 %v3341_v47, %s4429_s25 }
0x1440   :  { %v3148_v51 = vadd.f32 1.0, %v4411_v50 }
0x1442   :  { %4412 = vrcp.f32 %v3148_v51 }
0x144c   :  { %v4413_v55 = vpop.eup %4412 }
0x144d   :  { %v3155_v56 = vmul.f32 %v4413_v55, %v3153_v49 }
0x144f   :  { %3157 = vrot.lane.b32.xlu0 %v3155_v56, %s4434_s28 }
0x14a1   :  { %v3350_v53 = vpop.permute.xlu1 %3349 }
0x14a2   :  { %v3352_v57 = vmul.f32 %v4407_v14, %v3350_v53 }
0x14a4   :  { %3354 = vrot.lane.b32.xlu1 %v3352_v57, %s4428_s17 }
0x14b0   :  { %v3164_v60 = vpop.permute.xlu1 %3163 }
0x14b1   :  { %v3166_v59 = vmul.f32 %v4413_v55, %v3164_v60  ;;  %v3344_v62 = vpop.permute.xlu0 %3343 }
0x14b2   :  { %v3346_v63 = vadd.f32 %v3344_v62, %v5022_v21 }
0x14b3   :  { %3168 = vrot.lane.b32.xlu1 %v3166_v59, %s4435_s29 }
0x14b4   :  { %v3347_v58 = vmul.f32 %v4407_v14, %v3346_v63 }
0x14c1   :  { %v3158_v5 = vpop.permute.xlu0 %3157 }
0x14c2   :  { %v3160_v6 = vadd.f32 %v3158_v5, %v5033_v30 }
0x14c4   :  { %v3161_v10 = vmul.f32 %v4413_v55, %v3160_v6 }
0x1516   :  { %v3355_v0 = vpop.permute.xlu1 %3354 }
0x1517   :  { %v3357_v1 = vadd.f32 %v3355_v0, %v3347_v58 }
0x1519   :  { %4414 = vtanh.f32 %v3357_v1  ;;  %3621 = vst.msk [vmem:[#allocation2] sm:$0xff] %vm35_vm0, %v3357_v1 }
0x1523   :  { %v4415_v7 = vpop.eup %4414 }
0x1524   :  { %3360 = vrot.lane.b32.xlu0 %v4415_v7, %s4432_s4 }
0x1525   :  { %v3169_v18 = vpop.permute.xlu1 %3168 }
0x1526   :  { %v3171_v11 = vadd.f32 %v3169_v18, %v3161_v10 }
0x1528   :  { %4416 = vtanh.f32 %v3171_v11 }
0x1532   :  { %v4417_v12 = vpop.eup %4416 }
0x1533   :  { %3174 = vrot.lane.b32.xlu1 %v4417_v12, %s4429_s25 }
0x1596   :  { %v3361_v13 = vpop.permute.xlu0 %3360 }
0x1597   :  { %v3363_v16 = vmul.f32 %v4407_v14, %v3361_v13 }
0x1599   :  { %3365 = vrot.lane.b32.xlu0 %v3363_v16, %s4432_s4 }
0x159d   :  { %3595 = vrot.lane.b32.xlu0 %v5041_v23, %s4433_s14 }
0x15a5   :  { %v3175_v17 = vpop.permute.xlu1 %3174 }
0x15a6   :  { %v3177_v19 = vmul.f32 %v4413_v55, %v3175_v17 }
0x15a8   :  { %3513 = vrot.lane.b32.xlu1 %v3177_v19, %s4428_s17 }
0x160b   :  { %v3366_v20 = vpop.permute.xlu0 %3365 }
0x160c   :  { %3623 = vst.msk [vmem:[#allocation3] sm:$0xff] %vm35_vm0, %v3366_v20  ;;  %3993 = vmatmul.mubr.msk.f32.vlgmr.msra.gmra.mrb[14].mxu1 %vm35_vm0, %v3366_v20 }
0x160d   :  { %4229 = vmatpush3.bf16.msra.mxu1 %v4642_v61  ;;  %3999 = vmatprep.mubr.msk.f32.mxu1 %vm4431_vm1, %v4427_v3 }
0x160e   :  { %4230 = vmatprep.subr.bf16.mxu1 %v4430_v48 }
0x160f   :  { %v3596_v30 = vpop.permute.xlu0 %3595 }
0x1614   :  { %4000 = vmatmul.mubr.msk.f32.vlgmr.msra.gmra.mrb[14].mxu1 %vm38_vm2, %v3171_v11 }
0x1615   :  { %4232 = vmatpush3.bf16.msra.mxu1 %v4661_v2  ;;  %4006 = vmatprep.mubr.msk.f32.mxu1 %vm4431_vm1, %v4427_v3 }
0x161a   :  { %v3514_v21 = vpop.permute.xlu1 %3513 }
0x161c   :  { %4007 = vmatmul.mubr.msk.f32.vlgmr.msra.gmra.mrb[14].mxu1 %vm38_vm2, %v3514_v21 }
0x16ef   :  { %v3583_v24 = vpop.f32.mrb[14].mxu1 }
0x16f0   :  { %v4240_v25 = vadd.f32 %v4426_v44, %v3583_v24  ;;  %v4008_v27 = vpop.f32.mrb[15].mxu1 }
0x16f2   :  { %v3720_v28 = vmul.f32 -1.442695, %v4240_v25  ;;  %4418 = vtanh.f32 %v4240_v25 }
0x16f4   :  { %4420 = vpow2.f32 %v3720_v28 }
0x16fc   :  { %v4419_v61 = vpop.eup %4418 }
0x16fd   :  { %3606 = vrot.lane.b32.xlu1 %v4419_v61, %s4434_s28 }
0x16fe   :  { %v4421_v48 = vpop.eup %4420 }
0x16ff   :  { %v3591_v29 = vadd.f32 1.0, %v4421_v48 }
0x1701   :  { %4422 = vrcp.f32 %v3591_v29 }
0x170b   :  { %v4423_v2 = vpop.eup %4422 }
0x170c   :  { %v3598_v31 = vmul.f32 %v4423_v2, %v3596_v30 }
0x170e   :  { %3600 = vrot.lane.b32.xlu0 %v3598_v31, %s4434_s28 }
0x176f   :  { %v3607_v3 = vpop.permute.xlu1 %3606 }
0x1770   :  { %v3609_v22 = vmul.f32 %v4423_v2, %v3607_v3 }
0x1772   :  { %3611 = vrot.lane.b32.xlu1 %v3609_v22, %s4435_s29 }
0x1780   :  { %v3601_v32 = vpop.permute.xlu0 %3600 }
0x1781   :  { %v3603_v23 = vadd.f32 %v3601_v32, %v3171_v11 }
0x1783   :  { %v3604_v26 = vmul.f32 %v4423_v2, %v3603_v23 }
0x17e4   :  { %v3612_v33 = vpop.permute.xlu1 %3611 }
0x17e5   :  { %v3614_v34 = vadd.f32 %v3612_v33, %v3604_v26 }
0x17e7   :  { %4424 = vtanh.f32 %v3614_v34  ;;  %3624 = vst.msk [vmem:[#allocation4] sm:$0xff] %vm38_vm2, %v3614_v34  ;;  %3634 = vst.msk [vmem:[%s5125_s9] sm:$0xff] %vm38_vm2, %v3614_v34 }
0x17f1   :  { %v4425_v35 = vpop.eup %4424 }
0x17f2   :  { %3617 = vrot.lane.b32.xlu0 %v4425_v35, %s4429_s25 }
0x1864   :  { %v3618_v36 = vpop.permute.xlu0 %3617 }
0x1865   :  { %v3620_v37 = vmul.f32 %v4423_v2, %v3618_v36 }
0x1867   :  { %3626 = vrot.lane.b32.xlu1 %v3620_v37, %s4428_s17 }
0x18d9   :  { %v3627_v38 = vpop.permute.xlu1 %3626 }
0x18da   :  { %3629 = vst.msk [vmem:[#allocation5] sm:$0xff] %vm38_vm2, %v3627_v38  ;;  %3633 = vst.msk [vmem:[%s5126_s8] sm:$0xff] %vm38_vm2, %v3627_v38 }

</bundles_post_ra>
